<compile_context>
chip_gen: v7x
topology: tpu7x:2x2x1
jax: 0.10.0
libtpu: 0.0.40
codegen_flags: <defaults>
</compile_context>

<pallas_src>
import math

import jax
import jax.numpy as jnp
from jax import lax
from jax.experimental import pallas as pl
from jax.experimental.pallas import tpu as pltpu

# --- small synthetic model dims (stand-in for hidden_size=768 backbone) ---
VOCAB = 100
MAX_POS = 64
HIDDEN = 32
LAYERS = 2
HEADS = 4
HEAD_DIM = HIDDEN // HEADS
FFN = 64
NUM_LABELS = 2
LN_EPS = 1e-12
LANE_PAD = 128          # pad the 2-wide head output to a lane-dense 128-wide store
ROW_PAD = 8             # pad the B*B=4 output rows to a full 8-sublane store
NEG_INF = -1e9


# ---------------- parameters (deterministic synthetic init) ----------------

def init_params(key):
    def nrm(k, shape, scale=0.02):
        return scale * jax.random.normal(k, shape, dtype=jnp.float32)

    keys = jax.random.split(key, 4 + LAYERS)
    params = {
        'word_emb': nrm(keys[0], (VOCAB, HIDDEN)),
        'pos_emb': nrm(keys[1], (MAX_POS, HIDDEN)),
        'emb_ln_g': jnp.ones((HIDDEN,), jnp.float32),
        'emb_ln_b': jnp.zeros((HIDDEN,), jnp.float32),
        'head_w': nrm(keys[2], (HIDDEN, NUM_LABELS)),
        'head_b': jnp.zeros((NUM_LABELS,), jnp.float32),
    }
    layers = []
    for l in range(LAYERS):
        lk = jax.random.split(keys[4 + l], 6)
        layers.append(dict(
            wq=nrm(lk[0], (HIDDEN, HIDDEN)), bq=jnp.zeros((HIDDEN,), jnp.float32),
            wk=nrm(lk[1], (HIDDEN, HIDDEN)), bk=jnp.zeros((HIDDEN,), jnp.float32),
            wv=nrm(lk[2], (HIDDEN, HIDDEN)), bv=jnp.zeros((HIDDEN,), jnp.float32),
            wo=nrm(lk[3], (HIDDEN, HIDDEN)), bo=jnp.zeros((HIDDEN,), jnp.float32),
            ln1_g=jnp.ones((HIDDEN,), jnp.float32), ln1_b=jnp.zeros((HIDDEN,), jnp.float32),
            w1=nrm(lk[4], (HIDDEN, FFN)), b1=jnp.zeros((FFN,), jnp.float32),
            w2=nrm(lk[5], (FFN, HIDDEN)), b2=jnp.zeros((HIDDEN,), jnp.float32),
            ln2_g=jnp.ones((HIDDEN,), jnp.float32), ln2_b=jnp.zeros((HIDDEN,), jnp.float32),
        ))
    params['layers'] = layers
    return params


def pack_params(params):
    """Stack per-layer weights (fused QKV), cast all big matmul weights to bf16,
    fold the attention scale into Wq/bq, reshape biases/LN params to (1, N),
    pad the head weight to 128 lanes."""
    layers = params['layers']
    scale = 1.0 / math.sqrt(HEAD_DIM)

    def stk(fn):
        return jnp.stack([fn(l) for l in layers])

    packed = {
        'word_emb': params['word_emb'],
        'pos_emb': params['pos_emb'],
        'emb_ln_g': params['emb_ln_g'].reshape(1, HIDDEN),
        'emb_ln_b': params['emb_ln_b'].reshape(1, HIDDEN),
        # fused QKV weight (H, 3H); bf16 for the MXU; 1/sqrt(head_dim) folded into
        # Wq / bq at pack time so the kernel never scales the scores.
        'wqkv': stk(lambda l: jnp.concatenate(
            [l['wq'] * scale, l['wk'], l['wv']], axis=1)).astype(jnp.bfloat16),
        'bqkv': stk(lambda l: jnp.concatenate(
            [l['bq'] * scale, l['bk'], l['bv']])[None, :]),
        'wo': stk(lambda l: l['wo']).astype(jnp.bfloat16),   # bf16 at pack time
        'bo': stk(lambda l: l['bo'][None, :]),
        'ln1_g': stk(lambda l: l['ln1_g'][None, :]),
        'ln1_b': stk(lambda l: l['ln1_b'][None, :]),
        'w1': stk(lambda l: l['w1']).astype(jnp.bfloat16),
        'b1': stk(lambda l: l['b1'][None, :]),
        'w2': stk(lambda l: l['w2']).astype(jnp.bfloat16),
        'b2': stk(lambda l: l['b2'][None, :]),
        'ln2_g': stk(lambda l: l['ln2_g'][None, :]),
        'ln2_b': stk(lambda l: l['ln2_b'][None, :]),
        # head padded to 128 lanes -> lane-dense final store; sliced in the wrapper
        'head_w': jnp.zeros((HIDDEN, LANE_PAD), jnp.float32).at[:, :NUM_LABELS].set(params['head_w']),
        'head_b': jnp.zeros((1, LANE_PAD), jnp.float32).at[0, :NUM_LABELS].set(params['head_b']),
    }
    return packed


# ---------------- forward (mirrors RobertaHeadModel.forward) ----------------

def roberta_head_forward(packed, input_ids, attention_mask):
    B, S = input_ids.shape
    M = B * S

    # plain-JAX glue: embedding gather + positional add.
    # TODO(synk): at gte-base dims move this into the kernel via scalar-prefetched
    # input_ids and a pl.Element row-gather BlockSpec (saves one M x H HBM round trip).
    emb = jnp.take(packed['word_emb'], input_ids, axis=0) + packed['pos_emb'][:S][None, :, :]
    emb2d = emb.reshape(M, HIDDEN).astype(jnp.float32)

    # Additive attention bias over the flattened (M, M) token grid: blocks
    # cross-batch attention and padded keys; shared by all heads.  Tiny at toy dims.
    # TODO(synk): at real S build this per KV-tile in-kernel (flash-style) instead.
    mask_flat = attention_mask.reshape(M).astype(jnp.float32)
    batch_ids = jnp.repeat(jnp.arange(B, dtype=jnp.int32), S)
    attend_ok = (batch_ids[:, None] == batch_ids[None, :]) & (mask_flat[None, :] > 0)
    attn_bias = jnp.where(attend_ok, 0.0, NEG_INF).astype(jnp.float32)          # (M, M)

    # First-non-pad gather (torch's hidden[:, first_ix] (B, B, H) cross-product) as a
    # single matmul: block-diagonal gather matrix, rows padded to 8 sublanes.
    first_ix = jnp.argmax(attention_mask, axis=-1)                              # (B,)
    onehot = (first_ix[:, None] == jnp.arange(S)[None, :]).astype(jnp.float32)  # (B, S)
    gmat = jnp.kron(jnp.eye(B, dtype=jnp.float32), onehot)                      # (B*B, M)
    gmat = jnp.zeros((ROW_PAD, M), jnp.float32).at[:B * B, :].set(gmat)

    def fused_kernel(emb_ref, bias_ref, gmat_ref, eg_ref, ebb_ref,
                     wqkv_ref, bqkv_ref, wo_ref, bo_ref,
                     ln1g_ref, ln1b_ref, w1_ref, b1_ref, w2_ref, b2_ref,
                     ln2g_ref, ln2b_ref, hw_ref, hb_ref, out_ref):

        def layer_norm(x, g, b):                      # f32 statistics
            mean = jnp.mean(x, axis=-1, keepdims=True)
            cent = x - mean
            var = jnp.mean(cent * cent, axis=-1, keepdims=True)
            return cent * lax.rsqrt(var + LN_EPS) * g + b

        def mm(a, w_bf16):                            # bf16 MXU feed, f32 accumulate
            return jnp.dot(a.astype(jnp.bfloat16), w_bf16,
                           preferred_element_type=jnp.float32)

        # embedding LayerNorm (no zeros residual)
        h = layer_norm(emb_ref[...], eg_ref[...], ebb_ref[...])                 # (M, H) f32
        bias = bias_ref[...]                                                    # (M, M) f32

        # TODO(synk): at real gte-base dims convert this static unroll to a grid axis /
        # lax.fori_loop with layer-streamed weight BlockSpecs (bounds vreg live ranges,
        # enables weight-prefetch overlap, keeps one layer's weights in VMEM).
        for l in range(LAYERS):
            # fused QKV projection: one (M, H) x (H, 3H) matmul, single bf16 cast
            qkv = (mm(h, wqkv_ref[l]) + bqkv_ref[l]).astype(jnp.bfloat16)       # (M, 3H)

            # head-major stacks -> batched einsums over ALL heads at once
            q_h = jnp.stack([qkv[:, i * HEAD_DIM:(i + 1) * HEAD_DIM]
                             for i in range(HEADS)], axis=0)                    # (HEADS, M, D)
            k_h = jnp.stack([qkv[:, HIDDEN + i * HEAD_DIM:HIDDEN + (i + 1) * HEAD_DIM]
                             for i in range(HEADS)], axis=0)
            v_h = jnp.stack([qkv[:, 2 * HIDDEN + i * HEAD_DIM:2 * HIDDEN + (i + 1) * HEAD_DIM]
                             for i in range(HEADS)], axis=0)

            s = jnp.einsum('hmd,hnd->hmn', q_h, k_h,
                           preferred_element_type=jnp.float32) + bias           # (HEADS, M, M)
            mx = jnp.max(s, axis=-1, keepdims=True)
            p = jnp.exp(s - mx)
            p = p * pl.reciprocal(jnp.sum(p, axis=-1, keepdims=True), approx=True)
            ctx = jnp.einsum('hmn,hnd->hmd', p.astype(jnp.bfloat16), v_h,
                             preferred_element_type=jnp.float32)                # (HEADS, M, D)

            # single O-projection on the concatenated (M, H) context
            ctx_all = jnp.concatenate([ctx[i] for i in range(HEADS)], axis=-1)  # (M, H)
            attn = mm(ctx_all, wo_ref[l]) + bo_ref[l]

            h = layer_norm(attn + h, ln1g_ref[l], ln1b_ref[l])
            # TODO(synk): HF/gte uses erf GELU; tanh approximation keeps it on the EUP.
            inter = jax.nn.gelu(mm(h, w1_ref[l]) + b1_ref[l], approximate=True)
            ffn = mm(inter, w2_ref[l]) + b2_ref[l]
            h = layer_norm(ffn + h, ln2g_ref[l], ln2b_ref[l])

        # hidden[:, first_ix] as ONE matmul with the block-diagonal gather matrix,
        # then the 128-lane / 8-row padded 2-way linear head (one unmasked vreg store).
        gathered = jnp.dot(gmat_ref[...], h, preferred_element_type=jnp.float32)   # (ROW_PAD, H)
        logits = (jnp.dot(gathered, hw_ref[...], preferred_element_type=jnp.float32)
                  + hb_ref[...])
        out_ref[...] = logits.astype(out_ref.dtype)                                 # (ROW_PAD, LANE_PAD)

    vmem = pl.BlockSpec(memory_space=pltpu.MemorySpace.VMEM)
    logits_pad = pl.pallas_call(
        fused_kernel,
        out_shape=jax.ShapeDtypeStruct((ROW_PAD, LANE_PAD), jnp.float32),
        in_specs=[vmem] * 19,
        out_specs=vmem,
    )(emb2d, attn_bias, gmat,
      packed['emb_ln_g'], packed['emb_ln_b'],
      packed['wqkv'], packed['bqkv'], packed['wo'], packed['bo'],
      packed['ln1_g'], packed['ln1_b'], packed['w1'], packed['b1'],
      packed['w2'], packed['b2'], packed['ln2_g'], packed['ln2_b'],
      packed['head_w'], packed['head_b'])

    logits = logits_pad[:B * B, :NUM_LABELS].reshape(B, B, NUM_LABELS)
    if logits.shape[1] == 1:                                   # torch.squeeze(logits, dim=1)
        logits = jnp.squeeze(logits, axis=1)
    return logits


if __name__ == "__main__":
    key = jax.random.PRNGKey(0)
    pkey, ikey = jax.random.split(key)
    params = init_params(pkey)
    packed = pack_params(params)

    B, S = 2, 8
    input_ids = jax.random.randint(ikey, (B, S), 0, VOCAB, dtype=jnp.int32)
    attention_mask = jnp.array([[1, 1, 1, 1, 1, 1, 0, 0],
                                [0, 0, 1, 1, 1, 1, 1, 1]], dtype=jnp.int32)

    fwd = jax.jit(roberta_head_forward)
    logits = fwd(packed, input_ids, attention_mask)
    jax.block_until_ready(logits)
    assert logits.shape == (B, B, NUM_LABELS) and logits.dtype == jnp.float32
    print("KERNEL_OK")
</pallas_src>

<mosaic_0001>
module attributes {stable_mosaic.version = 11 : i64} {
  func.func @fused_kernel(%arg0: memref<16x32xf32, #tpu.memory_space<vmem>>, %arg1: memref<16x16xf32, #tpu.memory_space<vmem>>, %arg2: memref<8x16xf32, #tpu.memory_space<vmem>>, %arg3: memref<1x32xf32, #tpu.memory_space<vmem>>, %arg4: memref<1x32xf32, #tpu.memory_space<vmem>>, %arg5: memref<2x32x96xbf16, #tpu.memory_space<vmem>>, %arg6: memref<2x1x96xf32, #tpu.memory_space<vmem>>, %arg7: memref<2x32x32xbf16, #tpu.memory_space<vmem>>, %arg8: memref<2x1x32xf32, #tpu.memory_space<vmem>>, %arg9: memref<2x1x32xf32, #tpu.memory_space<vmem>>, %arg10: memref<2x1x32xf32, #tpu.memory_space<vmem>>, %arg11: memref<2x32x64xbf16, #tpu.memory_space<vmem>>, %arg12: memref<2x1x64xf32, #tpu.memory_space<vmem>>, %arg13: memref<2x64x32xbf16, #tpu.memory_space<vmem>>, %arg14: memref<2x1x32xf32, #tpu.memory_space<vmem>>, %arg15: memref<2x1x32xf32, #tpu.memory_space<vmem>>, %arg16: memref<2x1x32xf32, #tpu.memory_space<vmem>>, %arg17: memref<32x128xf32, #tpu.memory_space<vmem>>, %arg18: memref<1x128xf32, #tpu.memory_space<vmem>>, %arg19: memref<8x128xf32, #tpu.memory_space<vmem>>) attributes {dimension_semantics = [], scalar_prefetch = 0 : i64, scratch_operands = 0 : i64, tpu.core_type = #tpu.core_type<tc>} {
    %c0 = arith.constant 0 : index
    %c0_0 = arith.constant 0 : index
    %0 = vector.load %arg0[%c0, %c0_0] : memref<16x32xf32, #tpu.memory_space<vmem>>, vector<16x32xf32>
    %c0_1 = arith.constant 0 : index
    %c0_2 = arith.constant 0 : index
    %1 = vector.load %arg3[%c0_1, %c0_2] : memref<1x32xf32, #tpu.memory_space<vmem>>, vector<1x32xf32>
    %c0_3 = arith.constant 0 : index
    %c0_4 = arith.constant 0 : index
    %2 = vector.load %arg4[%c0_3, %c0_4] : memref<1x32xf32, #tpu.memory_space<vmem>>, vector<1x32xf32>
    %cst = arith.constant dense<0.000000e+00> : vector<16xf32>
    %3 = vector.multi_reduction <add>, %0, %cst [1] : vector<16x32xf32> to vector<16xf32>
    %4 = vector.shape_cast %3 : vector<16xf32> to vector<16x1xf32>
    %cst_5 = arith.constant 3.200000e+01 : f32
    %5 = vector.broadcast %cst_5 : f32 to vector<16x1xf32>
    %6 = arith.divf %4, %5 : vector<16x1xf32>
    %7 = vector.broadcast %6 : vector<16x1xf32> to vector<16x32xf32>
    %8 = arith.subf %0, %7 : vector<16x32xf32>
    %9 = arith.mulf %8, %8 : vector<16x32xf32>
    %cst_6 = arith.constant dense<0.000000e+00> : vector<16xf32>
    %10 = vector.multi_reduction <add>, %9, %cst_6 [1] : vector<16x32xf32> to vector<16xf32>
    %11 = vector.shape_cast %10 : vector<16xf32> to vector<16x1xf32>
    %cst_7 = arith.constant 3.200000e+01 : f32
    %12 = vector.broadcast %cst_7 : f32 to vector<16x1xf32>
    %13 = arith.divf %11, %12 : vector<16x1xf32>
    %cst_8 = arith.constant 9.99999996E-13 : f32
    %14 = vector.broadcast %cst_8 : f32 to vector<16x1xf32>
    %15 = arith.addf %13, %14 : vector<16x1xf32>
    %16 = math.rsqrt %15 : vector<16x1xf32>
    %17 = vector.broadcast %16 : vector<16x1xf32> to vector<16x32xf32>
    %18 = arith.mulf %8, %17 : vector<16x32xf32>
    %19 = vector.broadcast %1 : vector<1x32xf32> to vector<16x32xf32>
    %20 = arith.mulf %18, %19 : vector<16x32xf32>
    %21 = vector.broadcast %2 : vector<1x32xf32> to vector<16x32xf32>
    %22 = arith.addf %20, %21 : vector<16x32xf32>
    %c0_9 = arith.constant 0 : index
    %c0_10 = arith.constant 0 : index
    %23 = vector.load %arg1[%c0_9, %c0_10] : memref<16x16xf32, #tpu.memory_space<vmem>>, vector<16x16xf32>
    %c0_11 = arith.constant 0 : index
    %c0_12 = arith.constant 0 : index
    %c0_13 = arith.constant 0 : index
    %24 = vector.load %arg5[%c0_11, %c0_12, %c0_13] : memref<2x32x96xbf16, #tpu.memory_space<vmem>>, vector<1x32x96xbf16>
    %25 = vector.shape_cast %24 : vector<1x32x96xbf16> to vector<32x96xbf16>
    %26 = arith.truncf %22 : vector<16x32xf32> to vector<16x32xbf16>
    %cst_14 = arith.constant dense<0.000000e+00> : vector<16x96xf32>
    %27 = tpu.matmul %26, %25, %cst_14 {dimension_numbers = #tpu.dot_dimension_numbers<[1], [0], [0], [1], [0, 0, 1, 1], [], []>} : vector<16x32xbf16>, vector<32x96xbf16>, vector<16x96xf32> -> vector<16x96xf32>
    %c0_15 = arith.constant 0 : index
    %c0_16 = arith.constant 0 : index
    %c0_17 = arith.constant 0 : index
    %28 = vector.load %arg6[%c0_15, %c0_16, %c0_17] : memref<2x1x96xf32, #tpu.memory_space<vmem>>, vector<1x1x96xf32>
    %29 = vector.shape_cast %28 : vector<1x1x96xf32> to vector<1x96xf32>
    %30 = vector.broadcast %29 : vector<1x96xf32> to vector<16x96xf32>
    %31 = arith.addf %27, %30 : vector<16x96xf32>
    %32 = arith.truncf %31 : vector<16x96xf32> to vector<16x96xbf16>
    %33 = vector.extract_strided_slice %32 {offsets = [0, 0], sizes = [16, 8], strides = [1, 1]} : vector<16x96xbf16> to vector<16x8xbf16>
    %34 = vector.extract_strided_slice %32 {offsets = [0, 8], sizes = [16, 8], strides = [1, 1]} : vector<16x96xbf16> to vector<16x8xbf16>
    %35 = vector.extract_strided_slice %32 {offsets = [0, 16], sizes = [16, 8], strides = [1, 1]} : vector<16x96xbf16> to vector<16x8xbf16>
    %36 = vector.extract_strided_slice %32 {offsets = [0, 24], sizes = [16, 8], strides = [1, 1]} : vector<16x96xbf16> to vector<16x8xbf16>
    %37 = vector.shape_cast %33 : vector<16x8xbf16> to vector<1x16x8xbf16>
    %38 = vector.shape_cast %34 : vector<16x8xbf16> to vector<1x16x8xbf16>
    %39 = vector.shape_cast %35 : vector<16x8xbf16> to vector<1x16x8xbf16>
    %40 = vector.shape_cast %36 : vector<16x8xbf16> to vector<1x16x8xbf16>
    %41 = tpu.concatenate %37, %38, %39, %40 in 0 : vector<1x16x8xbf16>, vector<1x16x8xbf16>, vector<1x16x8xbf16>, vector<1x16x8xbf16> -> vector<4x16x8xbf16>
    %42 = vector.extract_strided_slice %32 {offsets = [0, 32], sizes = [16, 8], strides = [1, 1]} : vector<16x96xbf16> to vector<16x8xbf16>
    %43 = vector.extract_strided_slice %32 {offsets = [0, 40], sizes = [16, 8], strides = [1, 1]} : vector<16x96xbf16> to vector<16x8xbf16>
    %44 = vector.extract_strided_slice %32 {offsets = [0, 48], sizes = [16, 8], strides = [1, 1]} : vector<16x96xbf16> to vector<16x8xbf16>
    %45 = vector.extract_strided_slice %32 {offsets = [0, 56], sizes = [16, 8], strides = [1, 1]} : vector<16x96xbf16> to vector<16x8xbf16>
    %46 = vector.shape_cast %42 : vector<16x8xbf16> to vector<1x16x8xbf16>
    %47 = vector.shape_cast %43 : vector<16x8xbf16> to vector<1x16x8xbf16>
    %48 = vector.shape_cast %44 : vector<16x8xbf16> to vector<1x16x8xbf16>
    %49 = vector.shape_cast %45 : vector<16x8xbf16> to vector<1x16x8xbf16>
    %50 = tpu.concatenate %46, %47, %48, %49 in 0 : vector<1x16x8xbf16>, vector<1x16x8xbf16>, vector<1x16x8xbf16>, vector<1x16x8xbf16> -> vector<4x16x8xbf16>
    %51 = vector.extract_strided_slice %32 {offsets = [0, 64], sizes = [16, 8], strides = [1, 1]} : vector<16x96xbf16> to vector<16x8xbf16>
    %52 = vector.extract_strided_slice %32 {offsets = [0, 72], sizes = [16, 8], strides = [1, 1]} : vector<16x96xbf16> to vector<16x8xbf16>
    %53 = vector.extract_strided_slice %32 {offsets = [0, 80], sizes = [16, 8], strides = [1, 1]} : vector<16x96xbf16> to vector<16x8xbf16>
    %54 = vector.extract_strided_slice %32 {offsets = [0, 88], sizes = [16, 8], strides = [1, 1]} : vector<16x96xbf16> to vector<16x8xbf16>
    %55 = vector.shape_cast %51 : vector<16x8xbf16> to vector<1x16x8xbf16>
    %56 = vector.shape_cast %52 : vector<16x8xbf16> to vector<1x16x8xbf16>
    %57 = vector.shape_cast %53 : vector<16x8xbf16> to vector<1x16x8xbf16>
    %58 = vector.shape_cast %54 : vector<16x8xbf16> to vector<1x16x8xbf16>
    %59 = tpu.concatenate %55, %56, %57, %58 in 0 : vector<1x16x8xbf16>, vector<1x16x8xbf16>, vector<1x16x8xbf16>, vector<1x16x8xbf16> -> vector<4x16x8xbf16>
    "tpu.trace_start"() <{level = 10 : i32, message = "hmd,hnd->hmn"}> : () -> ()
    %cst_18 = arith.constant dense<0.000000e+00> : vector<4x16x16xf32>
    %60 = tpu.matmul %41, %50, %cst_18 {dimension_numbers = #tpu.dot_dimension_numbers<[2], [2], [1], [1], [0, 0, 0, 1, 1, 1], [0], [0]>} : vector<4x16x8xbf16>, vector<4x16x8xbf16>, vector<4x16x16xf32> -> vector<4x16x16xf32>
    "tpu.trace_stop"() : () -> ()
    %61 = vector.shape_cast %23 : vector<16x16xf32> to vector<1x16x16xf32>
    %62 = vector.broadcast %61 : vector<1x16x16xf32> to vector<4x16x16xf32>
    %63 = arith.addf %60, %62 : vector<4x16x16xf32>
    %cst_19 = arith.constant dense<0xFF800000> : vector<4x16xf32>
    %64 = vector.multi_reduction <maximumf>, %63, %cst_19 [2] : vector<4x16x16xf32> to vector<4x16xf32>
    %65 = vector.shape_cast %64 : vector<4x16xf32> to vector<4x16x1xf32>
    %66 = vector.broadcast %65 : vector<4x16x1xf32> to vector<4x16x16xf32>
    %67 = arith.subf %63, %66 : vector<4x16x16xf32>
    %68 = math.exp %67 : vector<4x16x16xf32>
    %cst_20 = arith.constant dense<0.000000e+00> : vector<4x16xf32>
    %69 = vector.multi_reduction <add>, %68, %cst_20 [2] : vector<4x16x16xf32> to vector<4x16xf32>
    %70 = vector.shape_cast %69 : vector<4x16xf32> to vector<4x16x1xf32>
    %71 = tpu.reciprocal %70 {approx = true} : vector<4x16x1xf32> -> vector<4x16x1xf32>
    %72 = vector.broadcast %71 : vector<4x16x1xf32> to vector<4x16x16xf32>
    %73 = arith.mulf %68, %72 : vector<4x16x16xf32>
    %74 = arith.truncf %73 : vector<4x16x16xf32> to vector<4x16x16xbf16>
    "tpu.trace_start"() <{level = 10 : i32, message = "hmn,hnd->hmd"}> : () -> ()
    %cst_21 = arith.constant dense<0.000000e+00> : vector<4x16x8xf32>
    %75 = tpu.matmul %74, %59, %cst_21 {dimension_numbers = #tpu.dot_dimension_numbers<[2], [1], [1], [2], [0, 0, 0, 1, 1, 2], [0], [0]>} : vector<4x16x16xbf16>, vector<4x16x8xbf16>, vector<4x16x8xf32> -> vector<4x16x8xf32>
    "tpu.trace_stop"() : () -> ()
    %76 = vector.extract_strided_slice %75 {offsets = [0, 0, 0], sizes = [1, 16, 8], strides = [1, 1, 1]} : vector<4x16x8xf32> to vector<1x16x8xf32>
    %77 = vector.shape_cast %76 : vector<1x16x8xf32> to vector<16x8xf32>
    %78 = vector.extract_strided_slice %75 {offsets = [1, 0, 0], sizes = [1, 16, 8], strides = [1, 1, 1]} : vector<4x16x8xf32> to vector<1x16x8xf32>
    %79 = vector.shape_cast %78 : vector<1x16x8xf32> to vector<16x8xf32>
    %80 = vector.extract_strided_slice %75 {offsets = [2, 0, 0], sizes = [1, 16, 8], strides = [1, 1, 1]} : vector<4x16x8xf32> to vector<1x16x8xf32>
    %81 = vector.shape_cast %80 : vector<1x16x8xf32> to vector<16x8xf32>
    %82 = vector.extract_strided_slice %75 {offsets = [3, 0, 0], sizes = [1, 16, 8], strides = [1, 1, 1]} : vector<4x16x8xf32> to vector<1x16x8xf32>
    %83 = vector.shape_cast %82 : vector<1x16x8xf32> to vector<16x8xf32>
    %84 = tpu.concatenate %77, %79, %81, %83 in 1 : vector<16x8xf32>, vector<16x8xf32>, vector<16x8xf32>, vector<16x8xf32> -> vector<16x32xf32>
    %c0_22 = arith.constant 0 : index
    %c0_23 = arith.constant 0 : index
    %c0_24 = arith.constant 0 : index
    %85 = vector.load %arg7[%c0_22, %c0_23, %c0_24] : memref<2x32x32xbf16, #tpu.memory_space<vmem>>, vector<1x32x32xbf16>
    %86 = vector.shape_cast %85 : vector<1x32x32xbf16> to vector<32x32xbf16>
    %87 = arith.truncf %84 : vector<16x32xf32> to vector<16x32xbf16>
    %cst_25 = arith.constant dense<0.000000e+00> : vector<16x32xf32>
    %88 = tpu.matmul %87, %86, %cst_25 {dimension_numbers = #tpu.dot_dimension_numbers<[1], [0], [0], [1], [0, 0, 1, 1], [], []>} : vector<16x32xbf16>, vector<32x32xbf16>, vector<16x32xf32> -> vector<16x32xf32>
    %c0_26 = arith.constant 0 : index
    %c0_27 = arith.constant 0 : index
    %c0_28 = arith.constant 0 : index
    %89 = vector.load %arg8[%c0_26, %c0_27, %c0_28] : memref<2x1x32xf32, #tpu.memory_space<vmem>>, vector<1x1x32xf32>
    %90 = vector.shape_cast %89 : vector<1x1x32xf32> to vector<1x32xf32>
    %91 = vector.broadcast %90 : vector<1x32xf32> to vector<16x32xf32>
    %92 = arith.addf %88, %91 : vector<16x32xf32>
    %93 = arith.addf %92, %22 : vector<16x32xf32>
    %c0_29 = arith.constant 0 : index
    %c0_30 = arith.constant 0 : index
    %c0_31 = arith.constant 0 : index
    %94 = vector.load %arg9[%c0_29, %c0_30, %c0_31] : memref<2x1x32xf32, #tpu.memory_space<vmem>>, vector<1x1x32xf32>
    %95 = vector.shape_cast %94 : vector<1x1x32xf32> to vector<1x32xf32>
    %c0_32 = arith.constant 0 : index
    %c0_33 = arith.constant 0 : index
    %c0_34 = arith.constant 0 : index
    %96 = vector.load %arg10[%c0_32, %c0_33, %c0_34] : memref<2x1x32xf32, #tpu.memory_space<vmem>>, vector<1x1x32xf32>
    %97 = vector.shape_cast %96 : vector<1x1x32xf32> to vector<1x32xf32>
    %cst_35 = arith.constant dense<0.000000e+00> : vector<16xf32>
    %98 = vector.multi_reduction <add>, %93, %cst_35 [1] : vector<16x32xf32> to vector<16xf32>
    %99 = vector.shape_cast %98 : vector<16xf32> to vector<16x1xf32>
    %cst_36 = arith.constant 3.200000e+01 : f32
    %100 = vector.broadcast %cst_36 : f32 to vector<16x1xf32>
    %101 = arith.divf %99, %100 : vector<16x1xf32>
    %102 = vector.broadcast %101 : vector<16x1xf32> to vector<16x32xf32>
    %103 = arith.subf %93, %102 : vector<16x32xf32>
    %104 = arith.mulf %103, %103 : vector<16x32xf32>
    %cst_37 = arith.constant dense<0.000000e+00> : vector<16xf32>
    %105 = vector.multi_reduction <add>, %104, %cst_37 [1] : vector<16x32xf32> to vector<16xf32>
    %106 = vector.shape_cast %105 : vector<16xf32> to vector<16x1xf32>
    %cst_38 = arith.constant 3.200000e+01 : f32
    %107 = vector.broadcast %cst_38 : f32 to vector<16x1xf32>
    %108 = arith.divf %106, %107 : vector<16x1xf32>
    %cst_39 = arith.constant 9.99999996E-13 : f32
    %109 = vector.broadcast %cst_39 : f32 to vector<16x1xf32>
    %110 = arith.addf %108, %109 : vector<16x1xf32>
    %111 = math.rsqrt %110 : vector<16x1xf32>
    %112 = vector.broadcast %111 : vector<16x1xf32> to vector<16x32xf32>
    %113 = arith.mulf %103, %112 : vector<16x32xf32>
    %114 = vector.broadcast %95 : vector<1x32xf32> to vector<16x32xf32>
    %115 = arith.mulf %113, %114 : vector<16x32xf32>
    %116 = vector.broadcast %97 : vector<1x32xf32> to vector<16x32xf32>
    %117 = arith.addf %115, %116 : vector<16x32xf32>
    %c0_40 = arith.constant 0 : index
    %c0_41 = arith.constant 0 : index
    %c0_42 = arith.constant 0 : index
    %118 = vector.load %arg11[%c0_40, %c0_41, %c0_42] : memref<2x32x64xbf16, #tpu.memory_space<vmem>>, vector<1x32x64xbf16>
    %119 = vector.shape_cast %118 : vector<1x32x64xbf16> to vector<32x64xbf16>
    %120 = arith.truncf %117 : vector<16x32xf32> to vector<16x32xbf16>
    %cst_43 = arith.constant dense<0.000000e+00> : vector<16x64xf32>
    %121 = tpu.matmul %120, %119, %cst_43 {dimension_numbers = #tpu.dot_dimension_numbers<[1], [0], [0], [1], [0, 0, 1, 1], [], []>} : vector<16x32xbf16>, vector<32x64xbf16>, vector<16x64xf32> -> vector<16x64xf32>
    %c0_44 = arith.constant 0 : index
    %c0_45 = arith.constant 0 : index
    %c0_46 = arith.constant 0 : index
    %122 = vector.load %arg12[%c0_44, %c0_45, %c0_46] : memref<2x1x64xf32, #tpu.memory_space<vmem>>, vector<1x1x64xf32>
    %123 = vector.shape_cast %122 : vector<1x1x64xf32> to vector<1x64xf32>
    %124 = vector.broadcast %123 : vector<1x64xf32> to vector<16x64xf32>
    %125 = arith.addf %121, %124 : vector<16x64xf32>
    %126 = arith.mulf %125, %125 : vector<16x64xf32>
    %127 = arith.mulf %125, %126 : vector<16x64xf32>
    %cst_47 = arith.constant 4.471500e-02 : f32
    %128 = vector.broadcast %cst_47 : f32 to vector<16x64xf32>
    %129 = arith.mulf %128, %127 : vector<16x64xf32>
    %130 = arith.addf %125, %129 : vector<16x64xf32>
    %cst_48 = arith.constant 0.797884583 : f32
    %131 = vector.broadcast %cst_48 : f32 to vector<16x64xf32>
    %132 = arith.mulf %131, %130 : vector<16x64xf32>
    %133 = math.tanh %132 : vector<16x64xf32>
    %cst_49 = arith.constant 1.000000e+00 : f32
    %134 = vector.broadcast %cst_49 : f32 to vector<16x64xf32>
    %135 = arith.addf %134, %133 : vector<16x64xf32>
    %cst_50 = arith.constant 5.000000e-01 : f32
    %136 = vector.broadcast %cst_50 : f32 to vector<16x64xf32>
    %137 = arith.mulf %136, %135 : vector<16x64xf32>
    %138 = arith.mulf %125, %137 : vector<16x64xf32>
    %c0_51 = arith.constant 0 : index
    %c0_52 = arith.constant 0 : index
    %c0_53 = arith.constant 0 : index
    %139 = vector.load %arg13[%c0_51, %c0_52, %c0_53] : memref<2x64x32xbf16, #tpu.memory_space<vmem>>, vector<1x64x32xbf16>
    %140 = vector.shape_cast %139 : vector<1x64x32xbf16> to vector<64x32xbf16>
    %141 = arith.truncf %138 : vector<16x64xf32> to vector<16x64xbf16>
    %cst_54 = arith.constant dense<0.000000e+00> : vector<16x32xf32>
    %142 = tpu.matmul %141, %140, %cst_54 {dimension_numbers = #tpu.dot_dimension_numbers<[1], [0], [0], [1], [0, 0, 1, 1], [], []>} : vector<16x64xbf16>, vector<64x32xbf16>, vector<16x32xf32> -> vector<16x32xf32>
    %c0_55 = arith.constant 0 : index
    %c0_56 = arith.constant 0 : index
    %c0_57 = arith.constant 0 : index
    %143 = vector.load %arg14[%c0_55, %c0_56, %c0_57] : memref<2x1x32xf32, #tpu.memory_space<vmem>>, vector<1x1x32xf32>
    %144 = vector.shape_cast %143 : vector<1x1x32xf32> to vector<1x32xf32>
    %145 = vector.broadcast %144 : vector<1x32xf32> to vector<16x32xf32>
    %146 = arith.addf %142, %145 : vector<16x32xf32>
    %147 = arith.addf %146, %117 : vector<16x32xf32>
    %c0_58 = arith.constant 0 : index
    %c0_59 = arith.constant 0 : index
    %c0_60 = arith.constant 0 : index
    %148 = vector.load %arg15[%c0_58, %c0_59, %c0_60] : memref<2x1x32xf32, #tpu.memory_space<vmem>>, vector<1x1x32xf32>
    %149 = vector.shape_cast %148 : vector<1x1x32xf32> to vector<1x32xf32>
    %c0_61 = arith.constant 0 : index
    %c0_62 = arith.constant 0 : index
    %c0_63 = arith.constant 0 : index
    %150 = vector.load %arg16[%c0_61, %c0_62, %c0_63] : memref<2x1x32xf32, #tpu.memory_space<vmem>>, vector<1x1x32xf32>
    %151 = vector.shape_cast %150 : vector<1x1x32xf32> to vector<1x32xf32>
    %cst_64 = arith.constant dense<0.000000e+00> : vector<16xf32>
    %152 = vector.multi_reduction <add>, %147, %cst_64 [1] : vector<16x32xf32> to vector<16xf32>
    %153 = vector.shape_cast %152 : vector<16xf32> to vector<16x1xf32>
    %cst_65 = arith.constant 3.200000e+01 : f32
    %154 = vector.broadcast %cst_65 : f32 to vector<16x1xf32>
    %155 = arith.divf %153, %154 : vector<16x1xf32>
    %156 = vector.broadcast %155 : vector<16x1xf32> to vector<16x32xf32>
    %157 = arith.subf %147, %156 : vector<16x32xf32>
    %158 = arith.mulf %157, %157 : vector<16x32xf32>
    %cst_66 = arith.constant dense<0.000000e+00> : vector<16xf32>
    %159 = vector.multi_reduction <add>, %158, %cst_66 [1] : vector<16x32xf32> to vector<16xf32>
    %160 = vector.shape_cast %159 : vector<16xf32> to vector<16x1xf32>
    %cst_67 = arith.constant 3.200000e+01 : f32
    %161 = vector.broadcast %cst_67 : f32 to vector<16x1xf32>
    %162 = arith.divf %160, %161 : vector<16x1xf32>
    %cst_68 = arith.constant 9.99999996E-13 : f32
    %163 = vector.broadcast %cst_68 : f32 to vector<16x1xf32>
    %164 = arith.addf %162, %163 : vector<16x1xf32>
    %165 = math.rsqrt %164 : vector<16x1xf32>
    %166 = vector.broadcast %165 : vector<16x1xf32> to vector<16x32xf32>
    %167 = arith.mulf %157, %166 : vector<16x32xf32>
    %168 = vector.broadcast %149 : vector<1x32xf32> to vector<16x32xf32>
    %169 = arith.mulf %167, %168 : vector<16x32xf32>
    %170 = vector.broadcast %151 : vector<1x32xf32> to vector<16x32xf32>
    %171 = arith.addf %169, %170 : vector<16x32xf32>
    %c1 = arith.constant 1 : index
    %c0_69 = arith.constant 0 : index
    %c0_70 = arith.constant 0 : index
    %172 = vector.load %arg5[%c1, %c0_69, %c0_70] : memref<2x32x96xbf16, #tpu.memory_space<vmem>>, vector<1x32x96xbf16>
    %173 = vector.shape_cast %172 : vector<1x32x96xbf16> to vector<32x96xbf16>
    %174 = arith.truncf %171 : vector<16x32xf32> to vector<16x32xbf16>
    %cst_71 = arith.constant dense<0.000000e+00> : vector<16x96xf32>
    %175 = tpu.matmul %174, %173, %cst_71 {dimension_numbers = #tpu.dot_dimension_numbers<[1], [0], [0], [1], [0, 0, 1, 1], [], []>} : vector<16x32xbf16>, vector<32x96xbf16>, vector<16x96xf32> -> vector<16x96xf32>
    %c1_72 = arith.constant 1 : index
    %c0_73 = arith.constant 0 : index
    %c0_74 = arith.constant 0 : index
    %176 = vector.load %arg6[%c1_72, %c0_73, %c0_74] : memref<2x1x96xf32, #tpu.memory_space<vmem>>, vector<1x1x96xf32>
    %177 = vector.shape_cast %176 : vector<1x1x96xf32> to vector<1x96xf32>
    %178 = vector.broadcast %177 : vector<1x96xf32> to vector<16x96xf32>
    %179 = arith.addf %175, %178 : vector<16x96xf32>
    %180 = arith.truncf %179 : vector<16x96xf32> to vector<16x96xbf16>
    %181 = vector.extract_strided_slice %180 {offsets = [0, 0], sizes = [16, 8], strides = [1, 1]} : vector<16x96xbf16> to vector<16x8xbf16>
    %182 = vector.extract_strided_slice %180 {offsets = [0, 8], sizes = [16, 8], strides = [1, 1]} : vector<16x96xbf16> to vector<16x8xbf16>
    %183 = vector.extract_strided_slice %180 {offsets = [0, 16], sizes = [16, 8], strides = [1, 1]} : vector<16x96xbf16> to vector<16x8xbf16>
    %184 = vector.extract_strided_slice %180 {offsets = [0, 24], sizes = [16, 8], strides = [1, 1]} : vector<16x96xbf16> to vector<16x8xbf16>
    %185 = vector.shape_cast %181 : vector<16x8xbf16> to vector<1x16x8xbf16>
    %186 = vector.shape_cast %182 : vector<16x8xbf16> to vector<1x16x8xbf16>
    %187 = vector.shape_cast %183 : vector<16x8xbf16> to vector<1x16x8xbf16>
    %188 = vector.shape_cast %184 : vector<16x8xbf16> to vector<1x16x8xbf16>
    %189 = tpu.concatenate %185, %186, %187, %188 in 0 : vector<1x16x8xbf16>, vector<1x16x8xbf16>, vector<1x16x8xbf16>, vector<1x16x8xbf16> -> vector<4x16x8xbf16>
    %190 = vector.extract_strided_slice %180 {offsets = [0, 32], sizes = [16, 8], strides = [1, 1]} : vector<16x96xbf16> to vector<16x8xbf16>
    %191 = vector.extract_strided_slice %180 {offsets = [0, 40], sizes = [16, 8], strides = [1, 1]} : vector<16x96xbf16> to vector<16x8xbf16>
    %192 = vector.extract_strided_slice %180 {offsets = [0, 48], sizes = [16, 8], strides = [1, 1]} : vector<16x96xbf16> to vector<16x8xbf16>
    %193 = vector.extract_strided_slice %180 {offsets = [0, 56], sizes = [16, 8], strides = [1, 1]} : vector<16x96xbf16> to vector<16x8xbf16>
    %194 = vector.shape_cast %190 : vector<16x8xbf16> to vector<1x16x8xbf16>
    %195 = vector.shape_cast %191 : vector<16x8xbf16> to vector<1x16x8xbf16>
    %196 = vector.shape_cast %192 : vector<16x8xbf16> to vector<1x16x8xbf16>
    %197 = vector.shape_cast %193 : vector<16x8xbf16> to vector<1x16x8xbf16>
    %198 = tpu.concatenate %194, %195, %196, %197 in 0 : vector<1x16x8xbf16>, vector<1x16x8xbf16>, vector<1x16x8xbf16>, vector<1x16x8xbf16> -> vector<4x16x8xbf16>
    %199 = vector.extract_strided_slice %180 {offsets = [0, 64], sizes = [16, 8], strides = [1, 1]} : vector<16x96xbf16> to vector<16x8xbf16>
    %200 = vector.extract_strided_slice %180 {offsets = [0, 72], sizes = [16, 8], strides = [1, 1]} : vector<16x96xbf16> to vector<16x8xbf16>
    %201 = vector.extract_strided_slice %180 {offsets = [0, 80], sizes = [16, 8], strides = [1, 1]} : vector<16x96xbf16> to vector<16x8xbf16>
    %202 = vector.extract_strided_slice %180 {offsets = [0, 88], sizes = [16, 8], strides = [1, 1]} : vector<16x96xbf16> to vector<16x8xbf16>
    %203 = vector.shape_cast %199 : vector<16x8xbf16> to vector<1x16x8xbf16>
    %204 = vector.shape_cast %200 : vector<16x8xbf16> to vector<1x16x8xbf16>
    %205 = vector.shape_cast %201 : vector<16x8xbf16> to vector<1x16x8xbf16>
    %206 = vector.shape_cast %202 : vector<16x8xbf16> to vector<1x16x8xbf16>
    %207 = tpu.concatenate %203, %204, %205, %206 in 0 : vector<1x16x8xbf16>, vector<1x16x8xbf16>, vector<1x16x8xbf16>, vector<1x16x8xbf16> -> vector<4x16x8xbf16>
    "tpu.trace_start"() <{level = 10 : i32, message = "hmd,hnd->hmn"}> : () -> ()
    %cst_75 = arith.constant dense<0.000000e+00> : vector<4x16x16xf32>
    %208 = tpu.matmul %189, %198, %cst_75 {dimension_numbers = #tpu.dot_dimension_numbers<[2], [2], [1], [1], [0, 0, 0, 1, 1, 1], [0], [0]>} : vector<4x16x8xbf16>, vector<4x16x8xbf16>, vector<4x16x16xf32> -> vector<4x16x16xf32>
    "tpu.trace_stop"() : () -> ()
    %209 = vector.shape_cast %23 : vector<16x16xf32> to vector<1x16x16xf32>
    %210 = vector.broadcast %209 : vector<1x16x16xf32> to vector<4x16x16xf32>
    %211 = arith.addf %208, %210 : vector<4x16x16xf32>
    %cst_76 = arith.constant dense<0xFF800000> : vector<4x16xf32>
    %212 = vector.multi_reduction <maximumf>, %211, %cst_76 [2] : vector<4x16x16xf32> to vector<4x16xf32>
    %213 = vector.shape_cast %212 : vector<4x16xf32> to vector<4x16x1xf32>
    %214 = vector.broadcast %213 : vector<4x16x1xf32> to vector<4x16x16xf32>
    %215 = arith.subf %211, %214 : vector<4x16x16xf32>
    %216 = math.exp %215 : vector<4x16x16xf32>
    %cst_77 = arith.constant dense<0.000000e+00> : vector<4x16xf32>
    %217 = vector.multi_reduction <add>, %216, %cst_77 [2] : vector<4x16x16xf32> to vector<4x16xf32>
    %218 = vector.shape_cast %217 : vector<4x16xf32> to vector<4x16x1xf32>
    %219 = tpu.reciprocal %218 {approx = true} : vector<4x16x1xf32> -> vector<4x16x1xf32>
    %220 = vector.broadcast %219 : vector<4x16x1xf32> to vector<4x16x16xf32>
    %221 = arith.mulf %216, %220 : vector<4x16x16xf32>
    %222 = arith.truncf %221 : vector<4x16x16xf32> to vector<4x16x16xbf16>
    "tpu.trace_start"() <{level = 10 : i32, message = "hmn,hnd->hmd"}> : () -> ()
    %cst_78 = arith.constant dense<0.000000e+00> : vector<4x16x8xf32>
    %223 = tpu.matmul %222, %207, %cst_78 {dimension_numbers = #tpu.dot_dimension_numbers<[2], [1], [1], [2], [0, 0, 0, 1, 1, 2], [0], [0]>} : vector<4x16x16xbf16>, vector<4x16x8xbf16>, vector<4x16x8xf32> -> vector<4x16x8xf32>
    "tpu.trace_stop"() : () -> ()
    %224 = vector.extract_strided_slice %223 {offsets = [0, 0, 0], sizes = [1, 16, 8], strides = [1, 1, 1]} : vector<4x16x8xf32> to vector<1x16x8xf32>
    %225 = vector.shape_cast %224 : vector<1x16x8xf32> to vector<16x8xf32>
    %226 = vector.extract_strided_slice %223 {offsets = [1, 0, 0], sizes = [1, 16, 8], strides = [1, 1, 1]} : vector<4x16x8xf32> to vector<1x16x8xf32>
    %227 = vector.shape_cast %226 : vector<1x16x8xf32> to vector<16x8xf32>
    %228 = vector.extract_strided_slice %223 {offsets = [2, 0, 0], sizes = [1, 16, 8], strides = [1, 1, 1]} : vector<4x16x8xf32> to vector<1x16x8xf32>
    %229 = vector.shape_cast %228 : vector<1x16x8xf32> to vector<16x8xf32>
    %230 = vector.extract_strided_slice %223 {offsets = [3, 0, 0], sizes = [1, 16, 8], strides = [1, 1, 1]} : vector<4x16x8xf32> to vector<1x16x8xf32>
    %231 = vector.shape_cast %230 : vector<1x16x8xf32> to vector<16x8xf32>
    %232 = tpu.concatenate %225, %227, %229, %231 in 1 : vector<16x8xf32>, vector<16x8xf32>, vector<16x8xf32>, vector<16x8xf32> -> vector<16x32xf32>
    %c1_79 = arith.constant 1 : index
    %c0_80 = arith.constant 0 : index
    %c0_81 = arith.constant 0 : index
    %233 = vector.load %arg7[%c1_79, %c0_80, %c0_81] : memref<2x32x32xbf16, #tpu.memory_space<vmem>>, vector<1x32x32xbf16>
    %234 = vector.shape_cast %233 : vector<1x32x32xbf16> to vector<32x32xbf16>
    %235 = arith.truncf %232 : vector<16x32xf32> to vector<16x32xbf16>
    %cst_82 = arith.constant dense<0.000000e+00> : vector<16x32xf32>
    %236 = tpu.matmul %235, %234, %cst_82 {dimension_numbers = #tpu.dot_dimension_numbers<[1], [0], [0], [1], [0, 0, 1, 1], [], []>} : vector<16x32xbf16>, vector<32x32xbf16>, vector<16x32xf32> -> vector<16x32xf32>
    %c1_83 = arith.constant 1 : index
    %c0_84 = arith.constant 0 : index
    %c0_85 = arith.constant 0 : index
    %237 = vector.load %arg8[%c1_83, %c0_84, %c0_85] : memref<2x1x32xf32, #tpu.memory_space<vmem>>, vector<1x1x32xf32>
    %238 = vector.shape_cast %237 : vector<1x1x32xf32> to vector<1x32xf32>
    %239 = vector.broadcast %238 : vector<1x32xf32> to vector<16x32xf32>
    %240 = arith.addf %236, %239 : vector<16x32xf32>
    %241 = arith.addf %240, %171 : vector<16x32xf32>
    %c1_86 = arith.constant 1 : index
    %c0_87 = arith.constant 0 : index
    %c0_88 = arith.constant 0 : index
    %242 = vector.load %arg9[%c1_86, %c0_87, %c0_88] : memref<2x1x32xf32, #tpu.memory_space<vmem>>, vector<1x1x32xf32>
    %243 = vector.shape_cast %242 : vector<1x1x32xf32> to vector<1x32xf32>
    %c1_89 = arith.constant 1 : index
    %c0_90 = arith.constant 0 : index
    %c0_91 = arith.constant 0 : index
    %244 = vector.load %arg10[%c1_89, %c0_90, %c0_91] : memref<2x1x32xf32, #tpu.memory_space<vmem>>, vector<1x1x32xf32>
    %245 = vector.shape_cast %244 : vector<1x1x32xf32> to vector<1x32xf32>
    %cst_92 = arith.constant dense<0.000000e+00> : vector<16xf32>
    %246 = vector.multi_reduction <add>, %241, %cst_92 [1] : vector<16x32xf32> to vector<16xf32>
    %247 = vector.shape_cast %246 : vector<16xf32> to vector<16x1xf32>
    %cst_93 = arith.constant 3.200000e+01 : f32
    %248 = vector.broadcast %cst_93 : f32 to vector<16x1xf32>
    %249 = arith.divf %247, %248 : vector<16x1xf32>
    %250 = vector.broadcast %249 : vector<16x1xf32> to vector<16x32xf32>
    %251 = arith.subf %241, %250 : vector<16x32xf32>
    %252 = arith.mulf %251, %251 : vector<16x32xf32>
    %cst_94 = arith.constant dense<0.000000e+00> : vector<16xf32>
    %253 = vector.multi_reduction <add>, %252, %cst_94 [1] : vector<16x32xf32> to vector<16xf32>
    %254 = vector.shape_cast %253 : vector<16xf32> to vector<16x1xf32>
    %cst_95 = arith.constant 3.200000e+01 : f32
    %255 = vector.broadcast %cst_95 : f32 to vector<16x1xf32>
    %256 = arith.divf %254, %255 : vector<16x1xf32>
    %cst_96 = arith.constant 9.99999996E-13 : f32
    %257 = vector.broadcast %cst_96 : f32 to vector<16x1xf32>
    %258 = arith.addf %256, %257 : vector<16x1xf32>
    %259 = math.rsqrt %258 : vector<16x1xf32>
    %260 = vector.broadcast %259 : vector<16x1xf32> to vector<16x32xf32>
    %261 = arith.mulf %251, %260 : vector<16x32xf32>
    %262 = vector.broadcast %243 : vector<1x32xf32> to vector<16x32xf32>
    %263 = arith.mulf %261, %262 : vector<16x32xf32>
    %264 = vector.broadcast %245 : vector<1x32xf32> to vector<16x32xf32>
    %265 = arith.addf %263, %264 : vector<16x32xf32>
    %c1_97 = arith.constant 1 : index
    %c0_98 = arith.constant 0 : index
    %c0_99 = arith.constant 0 : index
    %266 = vector.load %arg11[%c1_97, %c0_98, %c0_99] : memref<2x32x64xbf16, #tpu.memory_space<vmem>>, vector<1x32x64xbf16>
    %267 = vector.shape_cast %266 : vector<1x32x64xbf16> to vector<32x64xbf16>
    %268 = arith.truncf %265 : vector<16x32xf32> to vector<16x32xbf16>
    %cst_100 = arith.constant dense<0.000000e+00> : vector<16x64xf32>
    %269 = tpu.matmul %268, %267, %cst_100 {dimension_numbers = #tpu.dot_dimension_numbers<[1], [0], [0], [1], [0, 0, 1, 1], [], []>} : vector<16x32xbf16>, vector<32x64xbf16>, vector<16x64xf32> -> vector<16x64xf32>
    %c1_101 = arith.constant 1 : index
    %c0_102 = arith.constant 0 : index
    %c0_103 = arith.constant 0 : index
    %270 = vector.load %arg12[%c1_101, %c0_102, %c0_103] : memref<2x1x64xf32, #tpu.memory_space<vmem>>, vector<1x1x64xf32>
    %271 = vector.shape_cast %270 : vector<1x1x64xf32> to vector<1x64xf32>
    %272 = vector.broadcast %271 : vector<1x64xf32> to vector<16x64xf32>
    %273 = arith.addf %269, %272 : vector<16x64xf32>
    %274 = arith.mulf %273, %273 : vector<16x64xf32>
    %275 = arith.mulf %273, %274 : vector<16x64xf32>
    %cst_104 = arith.constant 4.471500e-02 : f32
    %276 = vector.broadcast %cst_104 : f32 to vector<16x64xf32>
    %277 = arith.mulf %276, %275 : vector<16x64xf32>
    %278 = arith.addf %273, %277 : vector<16x64xf32>
    %cst_105 = arith.constant 0.797884583 : f32
    %279 = vector.broadcast %cst_105 : f32 to vector<16x64xf32>
    %280 = arith.mulf %279, %278 : vector<16x64xf32>
    %281 = math.tanh %280 : vector<16x64xf32>
    %cst_106 = arith.constant 1.000000e+00 : f32
    %282 = vector.broadcast %cst_106 : f32 to vector<16x64xf32>
    %283 = arith.addf %282, %281 : vector<16x64xf32>
    %cst_107 = arith.constant 5.000000e-01 : f32
    %284 = vector.broadcast %cst_107 : f32 to vector<16x64xf32>
    %285 = arith.mulf %284, %283 : vector<16x64xf32>
    %286 = arith.mulf %273, %285 : vector<16x64xf32>
    %c1_108 = arith.constant 1 : index
    %c0_109 = arith.constant 0 : index
    %c0_110 = arith.constant 0 : index
    %287 = vector.load %arg13[%c1_108, %c0_109, %c0_110] : memref<2x64x32xbf16, #tpu.memory_space<vmem>>, vector<1x64x32xbf16>
    %288 = vector.shape_cast %287 : vector<1x64x32xbf16> to vector<64x32xbf16>
    %289 = arith.truncf %286 : vector<16x64xf32> to vector<16x64xbf16>
    %cst_111 = arith.constant dense<0.000000e+00> : vector<16x32xf32>
    %290 = tpu.matmul %289, %288, %cst_111 {dimension_numbers = #tpu.dot_dimension_numbers<[1], [0], [0], [1], [0, 0, 1, 1], [], []>} : vector<16x64xbf16>, vector<64x32xbf16>, vector<16x32xf32> -> vector<16x32xf32>
    %c1_112 = arith.constant 1 : index
    %c0_113 = arith.constant 0 : index
    %c0_114 = arith.constant 0 : index
    %291 = vector.load %arg14[%c1_112, %c0_113, %c0_114] : memref<2x1x32xf32, #tpu.memory_space<vmem>>, vector<1x1x32xf32>
    %292 = vector.shape_cast %291 : vector<1x1x32xf32> to vector<1x32xf32>
    %293 = vector.broadcast %292 : vector<1x32xf32> to vector<16x32xf32>
    %294 = arith.addf %290, %293 : vector<16x32xf32>
    %295 = arith.addf %294, %265 : vector<16x32xf32>
    %c1_115 = arith.constant 1 : index
    %c0_116 = arith.constant 0 : index
    %c0_117 = arith.constant 0 : index
    %296 = vector.load %arg15[%c1_115, %c0_116, %c0_117] : memref<2x1x32xf32, #tpu.memory_space<vmem>>, vector<1x1x32xf32>
    %297 = vector.shape_cast %296 : vector<1x1x32xf32> to vector<1x32xf32>
    %c1_118 = arith.constant 1 : index
    %c0_119 = arith.constant 0 : index
    %c0_120 = arith.constant 0 : index
    %298 = vector.load %arg16[%c1_118, %c0_119, %c0_120] : memref<2x1x32xf32, #tpu.memory_space<vmem>>, vector<1x1x32xf32>
    %299 = vector.shape_cast %298 : vector<1x1x32xf32> to vector<1x32xf32>
    %cst_121 = arith.constant dense<0.000000e+00> : vector<16xf32>
    %300 = vector.multi_reduction <add>, %295, %cst_121 [1] : vector<16x32xf32> to vector<16xf32>
    %301 = vector.shape_cast %300 : vector<16xf32> to vector<16x1xf32>
    %cst_122 = arith.constant 3.200000e+01 : f32
    %302 = vector.broadcast %cst_122 : f32 to vector<16x1xf32>
    %303 = arith.divf %301, %302 : vector<16x1xf32>
    %304 = vector.broadcast %303 : vector<16x1xf32> to vector<16x32xf32>
    %305 = arith.subf %295, %304 : vector<16x32xf32>
    %306 = arith.mulf %305, %305 : vector<16x32xf32>
    %cst_123 = arith.constant dense<0.000000e+00> : vector<16xf32>
    %307 = vector.multi_reduction <add>, %306, %cst_123 [1] : vector<16x32xf32> to vector<16xf32>
    %308 = vector.shape_cast %307 : vector<16xf32> to vector<16x1xf32>
    %cst_124 = arith.constant 3.200000e+01 : f32
    %309 = vector.broadcast %cst_124 : f32 to vector<16x1xf32>
    %310 = arith.divf %308, %309 : vector<16x1xf32>
    %cst_125 = arith.constant 9.99999996E-13 : f32
    %311 = vector.broadcast %cst_125 : f32 to vector<16x1xf32>
    %312 = arith.addf %310, %311 : vector<16x1xf32>
    %313 = math.rsqrt %312 : vector<16x1xf32>
    %314 = vector.broadcast %313 : vector<16x1xf32> to vector<16x32xf32>
    %315 = arith.mulf %305, %314 : vector<16x32xf32>
    %316 = vector.broadcast %297 : vector<1x32xf32> to vector<16x32xf32>
    %317 = arith.mulf %315, %316 : vector<16x32xf32>
    %318 = vector.broadcast %299 : vector<1x32xf32> to vector<16x32xf32>
    %319 = arith.addf %317, %318 : vector<16x32xf32>
    %c0_126 = arith.constant 0 : index
    %c0_127 = arith.constant 0 : index
    %320 = vector.load %arg2[%c0_126, %c0_127] : memref<8x16xf32, #tpu.memory_space<vmem>>, vector<8x16xf32>
    %cst_128 = arith.constant dense<0.000000e+00> : vector<8x32xf32>
    %321 = tpu.matmul %320, %319, %cst_128 {dimension_numbers = #tpu.dot_dimension_numbers<[1], [0], [0], [1], [0, 0, 1, 1], [], []>} : vector<8x16xf32>, vector<16x32xf32>, vector<8x32xf32> -> vector<8x32xf32>
    %c0_129 = arith.constant 0 : index
    %c0_130 = arith.constant 0 : index
    %322 = vector.load %arg17[%c0_129, %c0_130] : memref<32x128xf32, #tpu.memory_space<vmem>>, vector<32x128xf32>
    %cst_131 = arith.constant dense<0.000000e+00> : vector<8x128xf32>
    %323 = tpu.matmul %321, %322, %cst_131 {dimension_numbers = #tpu.dot_dimension_numbers<[1], [0], [0], [1], [0, 0, 1, 1], [], []>} : vector<8x32xf32>, vector<32x128xf32>, vector<8x128xf32> -> vector<8x128xf32>
    %c0_132 = arith.constant 0 : index
    %c0_133 = arith.constant 0 : index
    %324 = vector.load %arg18[%c0_132, %c0_133] : memref<1x128xf32, #tpu.memory_space<vmem>>, vector<1x128xf32>
    %325 = vector.broadcast %324 : vector<1x128xf32> to vector<8x128xf32>
    %326 = arith.addf %323, %325 : vector<8x128xf32>
    %c0_134 = arith.constant 0 : index
    %c0_135 = arith.constant 0 : index
    %327 = vector.load %arg19[%c0_134, %c0_135] : memref<8x128xf32, #tpu.memory_space<vmem>>, vector<8x128xf32>
    tpu.vector_store %arg19[%c0_134, %c0_135], %326 {strides = array<i32>} : memref<8x128xf32, #tpu.memory_space<vmem>>, vector<8x128xf32>,
    return
  }
}

</mosaic_0001>

<bundles_post_ra>
// kernel: roberta_head_forward.1
= control target key start
LH: loop header
LB: loop body
LE: loop exit
PB: predicated region body
PF: predicated region fallthrough
CT: control target
= control target key end

     0   :  { %vm67_vm0 = vcmask 261120   ;;  %v2625_v15 = vmov 0.0   ;;  %vm2626_vm1 = vmmov 0   ;;  %s2627_s21 = smov 112   ;;  %s2629_s22 = smov 104   ;;  %vm191_vm2 = vcmask 64512   ;;  %s3179_s0 = inlined_call_operand.vmem [shape: f32[16,32], index: 0, kind: input, shape index: {}]   ;;  %s3180_s5 = inlined_call_operand.vmem [shape: bf16[2,32,96], index: 5, kind: input, shape index: {}]   ;;  %s3181_s3 = inlined_call_operand.vmem [shape: f32[1,32], index: 3, kind: input, shape index: {}]   ;;  %s3182_s4 = inlined_call_operand.vmem [shape: f32[1,32], index: 4, kind: input, shape index: {}]   ;;  %s3183_s6 = inlined_call_operand.vmem [shape: f32[2,1,96], index: 6, kind: input, shape index: {}]   ;;  %s3184_s1 = inlined_call_operand.vmem [shape: f32[16,16], index: 1, kind: input, shape index: {}]   ;;  %s3185_s7 = inlined_call_operand.vmem [shape: bf16[2,32,32], index: 7, kind: input, shape index: {}]   ;;  %s3186_s8 = inlined_call_operand.vmem [shape: f32[2,1,32], index: 8, kind: input, shape index: {}]   ;;  %s3187_s11 = inlined_call_operand.vmem [shape: bf16[2,32,64], index: 11, kind: input, shape index: {}]   ;;  %s3188_s9 = inlined_call_operand.vmem [shape: f32[2,1,32], index: 9, kind: input, shape index: {}]   ;;  %s3189_s10 = inlined_call_operand.vmem [shape: f32[2,1,32], index: 10, kind: input, shape index: {}]   ;;  %s3190_s13 = inlined_call_operand.vmem [shape: bf16[2,64,32], index: 13, kind: input, shape index: {}]   ;;  %s3191_s12 = inlined_call_operand.vmem [shape: f32[2,1,64], index: 12, kind: input, shape index: {}]   ;;  %s3192_s14 = inlined_call_operand.vmem [shape: f32[2,1,32], index: 14, kind: input, shape index: {}]   ;;  %s3193_s15 = inlined_call_operand.vmem [shape: f32[2,1,32], index: 15, kind: input, shape index: {}]   ;;  %s3194_s16 = inlined_call_operand.vmem [shape: f32[2,1,32], index: 16, kind: input, shape index: {}]   ;;  %s3195_s17 = inlined_call_operand.vmem [shape: f32[32,128], index: 17, kind: input, shape index: {}]   ;;  %s3196_s2 = inlined_call_operand.vmem [shape: f32[8,16], index: 2, kind: input, shape index: {}]   ;;  %s3197_s18 = inlined_call_operand.vmem [shape: f32[1,128], index: 18, kind: input, shape index: {}]   ;;  %s3198_s19 = inlined_call_operand.vmem [shape: f32[8,128], index: 19, kind: output, shape index: {}]  }
   0x1   :  { %3201 = sst [smem:[#allocation2_spill]] %s3179_s0  ;;  %2277 = vmatprep.subr.bf16.mxu0 %v2625_v15  ;;  %2285 = vmatprep.subr.bf16.mxu1 %v2625_v15  ;;  %v2118_v34 = vld [vmem:[%s3183_s6] ss:$0 sm:$0xff]  ;;  %v2832_v55 = vld [vmem:[%s3184_s1 + $0x8] sm:$0xff]  ;;  %vm386_vm3 = vcmask 130048   ;;  %s2632_s30 = smov 8  }
   0x2   :  { %3202 = sst [smem:[#allocation3_spill]] %s3180_s5  ;;  %s3205_s20 = sld [smem:[#allocation2_spill]]  ;;  %2281 = vmatprep.mubr.msk.bf16.mxu0 %vm2626_vm1, %v2625_v15  ;;  %2287 = vmatprep.mubr.msk.bf16.mxu1 %vm2626_vm1, %v2625_v15  ;;  %v2827_v53 = vld [vmem:[%s3184_s1] sm:$0xff]  ;;  %vm695_vm4 = vcmask 195584   ;;  %vm938_vm5 = vcmask 523264  }
   0x3   :  { %3203 = sst [smem:[#allocation4_spill]] %s3181_s3  ;;  %s3206_s23 = sld [smem:[#allocation3_spill]] }
   0x4   :  { %3204 = sst [smem:[#allocation5_spill]] %s3182_s4  ;;  %s3207_s27 = sld [smem:[#allocation4_spill]] }
   0x5   :  { %s3208_s0 = sld [smem:[#allocation5_spill]]  ;;  %s2628_s5 = smov 120  }
   0x6   :  { %s2630_s3 = smov 96   ;;  %s2631_s1 = smov 64  }
   0x7   :  { %s2634_s24 = smov 24  }
   0x8   :  { %v63_v0 = vld [vmem:[%s3205_s20] sm:$0xff]  ;;  %v64_v1 = vld [vmem:[%s3205_s20 + $0x8] sm:$0xff]  ;;  %s2633_s20 = smov 16  }
   0x9   :  { %v68_v2 = vsel %vm67_vm0, %v63_v0, 0.0  ;;  %v71_v3 = vsel %vm67_vm0, %v64_v1, 0.0  ;;  %v2513_v14 = vld [vmem:[%s3206_s23] sm:$0xff]   ;;  %v2514_v16 = vld [vmem:[%s3206_s23 + $0x8] sm:$0xff]  }
   0xa   :  { %69 = vadd.xlane.f32.xlu0 %v68_v2  ;;  %2278 = vmatpush3.bf16.msra.mxu0 %v2513_v14  ;;  %v2116_v25 = vld [vmem:[%s3207_s27] ss:$0 sm:$0xff] }
   0xb   :  { %2279 = vmatprep.subr.bf16.mxu0 %v2625_v15  ;;  %v2117_v29 = vld [vmem:[%s3208_s0] ss:$0 sm:$0xff] }
   0xe   :  { %72 = vadd.xlane.f32.xlu0 %v71_v3  ;;  %2280 = vmatpush3.bf16.msra.mxu0 %v2514_v16 }
   0xf   :  { %2291 = vmatprep.subr.bf16.mxu0 %v2625_v15 }
  0x97   :  { %v70_v4 = vpop.xlane.xlu0 %69 }
  0x98   :  { %v75_v5 = vmul.f32 0.03125, %v70_v4 }
  0x9a   :  { %v77_v6 = vsub.f32 %v63_v0, %v75_v5 }
  0x9b   :  { %v73_v7 = vpop.xlane.xlu0 %72 }
  0x9c   :  { %v76_v8 = vmul.f32 0.03125, %v73_v7  ;;  %v79_v9 = vmul.f32 %v77_v6, %v77_v6 }
  0x9e   :  { %v78_v10 = vsub.f32 %v64_v1, %v76_v8  ;;  %v81_v11 = vsel %vm67_vm0, %v79_v9, 0.0 }
  0x9f   :  { %82 = vadd.xlane.f32.xlu1 %v81_v11 }
  0xa0   :  { %v80_v12 = vmul.f32 %v78_v10, %v78_v10 }
  0xa2   :  { %v84_v13 = vsel %vm67_vm0, %v80_v12, 0.0 }
  0xa3   :  { %85 = vadd.xlane.f32.xlu1 %v84_v13 }
 0x12c   :  { %v83_v17 = vpop.xlane.xlu1 %82 }
 0x12d   :  { %v87_v18 = vmul.f32 0.03125, %v83_v17 }
 0x12f   :  { %v89_v19 = vadd.f32 1e-12, %v87_v18 }
 0x130   :  { %v86_v20 = vpop.xlane.xlu1 %85 }
 0x131   :  { %2533 = vrsqrt.f32 %v89_v19  ;;  %v88_v21 = vmul.f32 0.03125, %v86_v20 }
 0x133   :  { %v90_v22 = vadd.f32 1e-12, %v88_v21 }
 0x135   :  { %2535 = vrsqrt.f32 %v90_v22 }
 0x13b   :  { %v2534_v23 = vpop.eup %2533 }
 0x13c   :  { %v93_v24 = vmul.f32 %v2534_v23, %v77_v6 }
 0x13e   :  { %v101_v28 = vmul.f32 %v2116_v25, %v93_v24 }
 0x13f   :  { %v2536_v26 = vpop.eup %2535 }
 0x140   :  { %v94_v27 = vmul.f32 %v2536_v26, %v78_v10  ;;  %v2766_v31 = vadd.f32 %v2117_v29, %v101_v28 }
 0x142   :  { %v102_v30 = vmul.f32 %v2116_v25, %v94_v27 }
 0x144   :  { %v2768_v32 = vadd.f32 %v2117_v29, %v102_v30 }
 0x146   :  { %v117_v33 = vpack.c.bf16 %v2768_v32, %v2766_v31 }
 0x148   :  { %2282 = vmatmul.mubr.msk.bf16.vlgmr.msra.gmra.mrb[0].mxu0 %vm67_vm0, %v117_v33 }
 0x149   :  { %2293 = vmatprep.mubr.msk.bf16.mxu0 %vm2626_vm1, %v2625_v15 }
 0x21b   :  { %v174_v35 = vpop.f32.mrb[0].mxu0 }
 0x21c   :  { %v2283_v36 = vpop.f32.mrb[1].mxu0  ;;  %v175_v38 = vadd.f32 %v2118_v34, %v174_v35 }
 0x21d   :  { %v177_v37 = vpop.f32.mrb[2].mxu0 }
 0x21e   :  { %v178_v39 = vadd.f32 %v2118_v34, %v177_v37  ;;  %v2284_v40 = vpop.f32.mrb[3].mxu0 }
 0x220   :  { %v2778_v41 = vpack.c.bf16 %v178_v39, %v175_v38 }
 0x222   :  { %185 = vrot.lane.b32.xlu1 %v2778_v41, %s2627_s21  ;;  %183 = vrot.lane.b32.xlu0 %v2778_v41, %s2628_s5 }
 0x226   :  { %187 = vrot.lane.b32.xlu1 %v2778_v41, %s2629_s22 }
 0x22a   :  { %189 = vrot.lane.b32.xlu1 %v2778_v41, %s2630_s3 }
 0x294   :  { %v2788_v42 = vpop.permute.xlu1 %185  ;;  %v2790_v43 = vpop.permute.xlu0 %183 }
 0x295   :  { %288 = vrot.lane.b32.xlu1 %v2788_v42, %s2630_s3  ;;  %239 = vrot.lane.b32.xlu0 %v2790_v43, %s2630_s3 }
 0x298   :  { %v2796_v44 = vpop.permute.xlu1 %187 }
 0x299   :  { %337 = vrot.lane.b32.xlu0 %v2796_v44, %s2630_s3 }
 0x29c   :  { %v190_v45 = vpop.permute.xlu1 %189 }
 0x29d   :  { %v196_v46 = vsel %vm191_vm2, %v190_v45, 0 }
 0x29e   :  { %2286 = vmatpush3.bf16.xpose.msra.mxu1 %v196_v46 }
 0x29f   :  { %2297 = vmatprep.subr.bf16.mxu1 %v2625_v15 }
 0x2a5   :  { %2288 = vmatmul.mubr.msk.bf16.vlgmr.msra.gmra.mrb[0].mxu1 %vm191_vm2, %v2778_v41 }
 0x2a6   :  { %2299 = vmatprep.mubr.msk.bf16.mxu1 %vm2626_vm1, %v2625_v15 }
 0x307   :  { %v289_v47 = vpop.permute.xlu1 %288  ;;  %v240_v48 = vpop.permute.xlu0 %239 }
 0x308   :  { %v294_v49 = vsel %vm191_vm2, %v289_v47, 0  ;;  %v245_v50 = vsel %vm191_vm2, %v240_v48, 0 }
 0x309   :  { %2292 = vmatpush3.bf16.xpose.msra.mxu0 %v245_v50  ;;  %2298 = vmatpush3.bf16.xpose.msra.mxu1 %v294_v49 }
 0x30a   :  { %2303 = vmatprep.subr.bf16.mxu0 %v2625_v15  ;;  %2309 = vmatprep.subr.bf16.mxu1 %v2625_v15 }
 0x30b   :  { %v338_v51 = vpop.permute.xlu0 %337 }
 0x30c   :  { %v343_v52 = vsel %vm191_vm2, %v338_v51, 0 }
 0x310   :  { %2294 = vmatmul.mubr.msk.bf16.vlgmr.msra.gmra.mrb[4].mxu0 %vm191_vm2, %v2790_v43  ;;  %2300 = vmatmul.mubr.msk.bf16.vlgmr.msra.gmra.mrb[4].mxu1 %vm191_vm2, %v2788_v42 }
 0x311   :  { %2304 = vmatpush3.bf16.xpose.msra.mxu0 %v343_v52  ;;  %2305 = vmatprep.mubr.msk.bf16.mxu0 %vm2626_vm1, %v2625_v15 }
 0x312   :  { %2311 = vmatprep.mubr.msk.bf16.mxu1 %vm2626_vm1, %v2625_v15  ;;  %2315 = vmatprep.subr.bf16.mxu0 %v2625_v15 }
 0x318   :  { %2306 = vmatmul.mubr.msk.bf16.vlgmr.msra.gmra.mrb[8].mxu0 %vm191_vm2, %v2796_v44 }
 0x319   :  { %2317 = vmatprep.mubr.msk.bf16.mxu0 %vm2626_vm1, %v2625_v15 }
 0x378   :  { %v232_v54 = vpop.f32.mrb[0].mxu1 }
 0x379   :  { %v233_v56 = vadd.f32 %v232_v54, %v2827_v53  ;;  %v2289_v57 = vpop.f32.mrb[1].mxu1 }
 0x37a   :  { %v235_v58 = vpop.f32.mrb[2].mxu1 }
 0x37b   :  { %v236_v59 = vadd.f32 %v235_v58, %v2832_v55  ;;  %v2290_v60 = vpop.f32.mrb[3].mxu1  ;;  %v387_v61 = vsel %vm386_vm3, %v233_v56, -inf }
 0x37c   :  { %388 = vmax.xlane.f32.xlu1 %v387_v61 }
 0x37d   :  { %v390_v62 = vsel %vm386_vm3, %v236_v59, -inf }
 0x37e   :  { %391 = vmax.xlane.f32.xlu0 %v390_v62 }
 0x3e3   :  { %v281_v63 = vpop.f32.mrb[4].mxu0  ;;  %v330_v0 = vpop.f32.mrb[4].mxu1 }
 0x3e4   :  { %v282_v1 = vadd.f32 %v281_v63, %v2827_v53  ;;  %v331_v2 = vadd.f32 %v330_v0, %v2827_v53  ;;  %v2295_v3 = vpop.f32.mrb[5].mxu0  ;;  %v2301_v4 = vpop.f32.mrb[5].mxu1 }
 0x3e5   :  { %v284_v5 = vpop.f32.mrb[6].mxu0  ;;  %v333_v6 = vpop.f32.mrb[6].mxu1 }
 0x3e6   :  { %v285_v7 = vadd.f32 %v284_v5, %v2832_v55  ;;  %v2296_v8 = vpop.f32.mrb[7].mxu0  ;;  %v2302_v9 = vpop.f32.mrb[7].mxu1  ;;  %v399_v10 = vsel %vm386_vm3, %v331_v2, -inf  ;;  %v393_v11 = vsel %vm386_vm3, %v282_v1, -inf  ;;  %v334_v12 = vadd.f32 %v333_v6, %v2832_v55 }
 0x3e7   :  { %400 = vmax.xlane.f32.xlu1 %v399_v10  ;;  %394 = vmax.xlane.f32.xlu0 %v393_v11 }
 0x3e8   :  { %v396_v13 = vsel %vm386_vm3, %v285_v7, -inf  ;;  %v402_v21 = vsel %vm386_vm3, %v334_v12, -inf }
 0x3eb   :  { %397 = vmax.xlane.f32.xlu0 %v396_v13  ;;  %v379_v14 = vpop.f32.mrb[8].mxu0 }
 0x3ec   :  { %v380_v16 = vadd.f32 %v379_v14, %v2827_v53  ;;  %v2307_v17 = vpop.f32.mrb[9].mxu0 }
 0x3ed   :  { %v382_v18 = vpop.f32.mrb[10].mxu0 }
 0x3ee   :  { %v383_v19 = vadd.f32 %v382_v18, %v2832_v55  ;;  %v2308_v20 = vpop.f32.mrb[11].mxu0  ;;  %v405_v22 = vsel %vm386_vm3, %v380_v16, -inf }
 0x3ef   :  { %403 = vmax.xlane.f32.xlu0 %v402_v21  ;;  %406 = vmax.xlane.f32.xlu1 %v405_v22 }
 0x3f0   :  { %v408_v23 = vsel %vm386_vm3, %v383_v19, -inf }
 0x3f3   :  { %409 = vmax.xlane.f32.xlu0 %v408_v23 }
 0x400   :  { %479 = vrot.lane.b32.xlu1 %v2778_v41, %s2631_s1 }
 0x409   :  { %v389_v24 = vpop.xlane.xlu1 %388 }
 0x40a   :  { %v411_v27 = vsub.f32 %v233_v56, %v389_v24 }
 0x40b   :  { %v392_v25 = vpop.xlane.xlu0 %391 }
 0x40c   :  { %v412_v26 = vsub.f32 %v236_v59, %v392_v25  ;;  %v419_v29 = vmul.f32 1.442695, %v411_v27 }
 0x40e   :  { %v421_v28 = vmul.f32 1.442695, %v412_v26 }
 0x410   :  { %2537 = vpow2.f32 %v421_v28 }
 0x411   :  { %2539 = vpow2.f32 %v419_v29 }
 0x41a   :  { %v2538_v30 = vpop.eup %2537 }
 0x41b   :  { %v438_v33 = vsel %vm386_vm3, %v2538_v30, 0.0  ;;  %v2540_v34 = vpop.eup %2539 }
 0x41c   :  { %439 = vadd.xlane.f32.xlu0 %v438_v33  ;;  %v435_v35 = vsel %vm386_vm3, %v2540_v34, 0.0 }
 0x424   :  { %436 = vadd.xlane.f32.xlu1 %v435_v35 }
 0x474   :  { %v401_v36 = vpop.xlane.xlu1 %400  ;;  %v395_v37 = vpop.xlane.xlu0 %394 }
 0x475   :  { %v415_v38 = vsub.f32 %v331_v2, %v401_v36  ;;  %v413_v39 = vsub.f32 %v282_v1, %v395_v37 }
 0x477   :  { %v423_v40 = vmul.f32 1.442695, %v413_v39  ;;  %v427_v41 = vmul.f32 1.442695, %v415_v38 }
 0x478   :  { %v398_v45 = vpop.xlane.xlu0 %397 }
 0x479   :  { %v414_v46 = vsub.f32 %v285_v7, %v398_v45  ;;  %2541 = vpow2.f32 %v423_v40 }
 0x47a   :  { %2543 = vpow2.f32 %v427_v41 }
 0x47b   :  { %v425_v47 = vmul.f32 1.442695, %v414_v46  ;;  %v2515_v46 = vld [vmem:[%s3185_s7] sm:$0xff]  }
 0x47c   :  { %v404_v48 = vpop.xlane.xlu0 %403  ;;  %v407_v49 = vpop.xlane.xlu1 %406 }
 0x47d   :  { %2545 = vpow2.f32 %v425_v47  ;;  %v416_v50 = vsub.f32 %v334_v12, %v404_v48  ;;  %v417_v51 = vsub.f32 %v380_v16, %v407_v49  ;;  %v2516_v49 = vld [vmem:[%s3185_s7 + $0x8] sm:$0xff]  }
 0x47f   :  { %v429_v52 = vmul.f32 1.442695, %v416_v50  ;;  %v431_v54 = vmul.f32 1.442695, %v417_v51 }
 0x480   :  { %v480_v56 = vpop.permute.xlu1 %479  ;;  %v410_v57 = vpop.xlane.xlu0 %409 }
 0x481   :  { %2547 = vpow2.f32 %v429_v52  ;;  %v418_v58 = vsub.f32 %v383_v19, %v410_v57  ;;  %2310 = vmatpush3.bf16.msra.mxu1 %v480_v56 }
 0x482   :  { %2549 = vpow2.f32 %v431_v54  ;;  %2321 = vmatprep.subr.bf16.mxu1 %v2625_v15 }
 0x483   :  { %v433_v59 = vmul.f32 1.442695, %v418_v58  ;;  %v2542_v60 = vpop.eup %2541 }
 0x484   :  { %v441_v61 = vsel %vm386_vm3, %v2542_v60, 0.0  ;;  %v2544_v62 = vpop.eup %2543 }
 0x485   :  { %2551 = vpow2.f32 %v433_v59  ;;  %442 = vadd.xlane.f32.xlu1 %v441_v61  ;;  %v447_v1 = vsel %vm386_vm3, %v2544_v62, 0.0 }
 0x487   :  { %v2546_v63 = vpop.eup %2545 }
 0x488   :  { %v444_v0 = vsel %vm386_vm3, %v2546_v63, 0.0 }
 0x489   :  { %445 = vadd.xlane.f32.xlu0 %v444_v0  ;;  %448 = vadd.xlane.f32.xlu1 %v447_v1 }
 0x48b   :  { %v2548_v2 = vpop.eup %2547 }
 0x48c   :  { %v2550_v3 = vpop.eup %2549  ;;  %v450_v4 = vsel %vm386_vm3, %v2548_v2, 0.0 }
 0x48d   :  { %v453_v5 = vsel %vm386_vm3, %v2550_v3, 0.0  ;;  %451 = vadd.xlane.f32.xlu0 %v450_v4 }
 0x48e   :  { %454 = vadd.xlane.f32.xlu1 %v453_v5 }
 0x48f   :  { %v2552_v6 = vpop.eup %2551 }
 0x490   :  { %v456_v7 = vsel %vm386_vm3, %v2552_v6, 0.0 }
 0x491   :  { %457 = vadd.xlane.f32.xlu0 %v456_v7 }
 0x49f   :  { %573 = vrot.lane.b32.xlu1 %v2788_v42, %s2631_s1 }
 0x4a3   :  { %620 = vrot.lane.b32.xlu1 %v2796_v44, %s2631_s1 }
 0x4a7   :  { %526 = vrot.lane.b32.xlu0 %v2790_v43, %s2631_s1 }
 0x4a9   :  { %v440_v8 = vpop.xlane.xlu0 %439 }
 0x4aa   :  { %2553 = vrcp.f32 %v440_v8 }
 0x4b1   :  { %v437_v9 = vpop.xlane.xlu1 %436 }
 0x4b2   :  { %2555 = vrcp.f32 %v437_v9 }
 0x4b4   :  { %v2554_v10 = vpop.eup %2553 }
 0x4b5   :  { %v468_v12 = vmul.f32 %v2554_v10, %v2538_v30 }
 0x4bc   :  { %v2556_v11 = vpop.eup %2555 }
 0x4bd   :  { %v467_v13 = vmul.f32 %v2556_v11, %v2540_v34 }
 0x4bf   :  { %v475_v14 = vpack.c.bf16 %v468_v12, %v467_v13 }
 0x4c1   :  { %2312 = vmatmul.mubr.msk.bf16.vlgmr.msra.gmra.mrb[8].mxu1 %vm386_vm3, %v475_v14 }
 0x4c2   :  { %2323 = vmatprep.mubr.msk.bf16.mxu1 %vm2626_vm1, %v2625_v15 }
 0x512   :  { %v443_v42 = vpop.xlane.xlu1 %442 }
 0x513   :  { %2557 = vrcp.f32 %v443_v42 }
 0x516   :  { %v446_v44 = vpop.xlane.xlu0 %445  ;;  %v449_v16 = vpop.xlane.xlu1 %448 }
 0x517   :  { %2559 = vrcp.f32 %v446_v44 }
 0x518   :  { %2561 = vrcp.f32 %v449_v16  ;;  %v2130_v16 = vld [vmem:[%s3186_s8] ss:$0 sm:$0xff] }
 0x51a   :  { %v452_v43 = vpop.xlane.xlu0 %451 }
 0x51b   :  { %v455_v17 = vpop.xlane.xlu1 %454  ;;  %2563 = vrcp.f32 %v452_v43 }
 0x51c   :  { %2565 = vrcp.f32 %v455_v17 }
 0x51d   :  { %v2558_v19 = vpop.eup %2557 }
 0x51e   :  { %v458_v18 = vpop.xlane.xlu0 %457  ;;  %v469_v22 = vmul.f32 %v2558_v19, %v2542_v60 }
 0x51f   :  { %v574_v20 = vpop.permute.xlu1 %573  ;;  %2567 = vrcp.f32 %v458_v18 }
 0x520   :  { %2322 = vmatpush3.bf16.msra.mxu1 %v574_v20 }
 0x521   :  { %v2560_v21 = vpop.eup %2559  ;;  %2333 = vmatprep.subr.bf16.mxu1 %v2625_v15 }
 0x522   :  { %v470_v23 = vmul.f32 %v2560_v21, %v2546_v63  ;;  %v527_v24 = vpop.permute.xlu0 %526  ;;  %v2562_v25 = vpop.eup %2561 }
 0x523   :  { %2316 = vmatpush3.bf16.msra.mxu0 %v527_v24  ;;  %v471_v28 = vmul.f32 %v2562_v25, %v2544_v62  ;;  %v621_v30 = vpop.permute.xlu1 %620 }
 0x524   :  { %v476_v26 = vpack.c.bf16 %v470_v23, %v469_v22  ;;  %2327 = vmatprep.subr.bf16.mxu0 %v2625_v15 }
 0x525   :  { %v2564_v27 = vpop.eup %2563 }
 0x526   :  { %v472_v29 = vmul.f32 %v2564_v27, %v2548_v2  ;;  %2318 = vmatmul.mubr.msk.bf16.vlgmr.msra.gmra.mrb[12].mxu0 %vm386_vm3, %v476_v26  ;;  %v2566_v33 = vpop.eup %2565 }
 0x527   :  { %2328 = vmatpush3.bf16.msra.mxu0 %v621_v30  ;;  %2329 = vmatprep.mubr.msk.bf16.mxu0 %vm2626_vm1, %v2625_v15  ;;  %v473_v36 = vmul.f32 %v2566_v33, %v2550_v3 }
 0x528   :  { %v477_v34 = vpack.c.bf16 %v472_v29, %v471_v28  ;;  %2341 = vmatprep.subr.bf16.mxu0 %v2625_v15 }
 0x529   :  { %v2568_v35 = vpop.eup %2567 }
 0x52a   :  { %v474_v37 = vmul.f32 %v2568_v35, %v2552_v6  ;;  %2324 = vmatmul.mubr.msk.bf16.vlgmr.msra.gmra.mrb[12].mxu1 %vm386_vm3, %v477_v34 }
 0x52b   :  { %2337 = vmatprep.mubr.msk.bf16.mxu1 %vm2626_vm1, %v2625_v15  ;;  %2334 = vmatpush3.bf16.msra.mxu1 %v2515_v46 }
 0x52c   :  { %v478_v38 = vpack.c.bf16 %v474_v37, %v473_v36  ;;  %2335 = vmatprep.subr.bf16.mxu1 %v2625_v15  ;;  %v2518_v37 = vld [vmem:[%s3187_s11 + $0x8] sm:$0xff]  }
 0x52e   :  { %2330 = vmatmul.mubr.msk.bf16.vlgmr.msra.gmra.mrb[16].mxu0 %vm386_vm3, %v478_v38 }
 0x52f   :  { %2345 = vmatprep.mubr.msk.bf16.mxu0 %vm2626_vm1, %v2625_v15  ;;  %2336 = vmatpush3.bf16.msra.mxu1 %v2516_v49  ;;  %v2134_v49 = vld [vmem:[%s3188_s9] ss:$0 sm:$0xff] }
 0x530   :  { %2349 = vmatprep.subr.bf16.mxu1 %v2625_v15 }
 0x594   :  { %v519_v39 = vpop.f32.mrb[8].mxu1 }
 0x595   :  { %v2313_v40 = vpop.f32.mrb[9].mxu1 }
 0x596   :  { %v522_v41 = vpop.f32.mrb[10].mxu1 }
 0x597   :  { %v2314_v45 = vpop.f32.mrb[11].mxu1 }
 0x5f9   :  { %v566_v47 = vpop.f32.mrb[12].mxu0 }
 0x5fa   :  { %v2319_v48 = vpop.f32.mrb[13].mxu0 }
 0x5fb   :  { %v569_v50 = vpop.f32.mrb[14].mxu0 }
 0x5fc   :  { %v2483_v51 = vpack.i.bf16 %v569_v50, %v566_v47  ;;  %v2320_v52 = vpop.f32.mrb[15].mxu0 }
 0x5fd   :  { %v613_v54 = vpop.f32.mrb[12].mxu1 }
 0x5fe   :  { %v2325_v56 = vpop.f32.mrb[13].mxu1  ;;  %2484 = vrot.lane.b32.xlu1 %v2483_v51, %s2632_s30 }
 0x5ff   :  { %v616_v57 = vpop.f32.mrb[14].mxu1 }
 0x600   :  { %v2488_v58 = vpack.i.bf16 %v616_v57, %v613_v54  ;;  %v2326_v59 = vpop.f32.mrb[15].mxu1  ;;  %v2135_v54 = vld [vmem:[%s3189_s10] ss:$0 sm:$0xff] }
 0x601   :  { %v660_v60 = vpop.f32.mrb[16].mxu0 }
 0x602   :  { %2489 = vrot.lane.b32.xlu0 %v2488_v58, %s2633_s20  ;;  %v2331_v61 = vpop.f32.mrb[17].mxu0 }
 0x603   :  { %v663_v62 = vpop.f32.mrb[18].mxu0  ;;  %v2520_v61 = vld [vmem:[%s3190_s13 + $0x8] sm:$0xff]  }
 0x604   :  { %v2493_v63 = vpack.i.bf16 %v663_v62, %v660_v60  ;;  %v2332_v0 = vpop.f32.mrb[19].mxu0  ;;  %v2519_v60 = vld [vmem:[%s3190_s13] sm:$0xff]   ;;  %v2521_v62 = vld [vmem:[%s3190_s13 + $0x10] sm:$0xff]  }
 0x605   :  { %v2136_v0 = vld [vmem:[%s3191_s12] ss:$0 sm:$0xff] }
 0x606   :  { %2494 = vrot.lane.b32.xlu1 %v2493_v63, %s2634_s24  ;;  %v2522_v63 = vld [vmem:[%s3190_s13 + $0x18] sm:$0xff]  }
 0x670   :  { %v2485_v1 = vpop.permute.xlu1 %2484 }
 0x671   :  { %v2487_v3 = vunpack.i.h.bf16 %v2485_v1  ;;  %v2486_v4 = vunpack.i.l.bf16 %v2485_v1 }
 0x673   :  { %v692_v8 = vsel %vm191_vm2, %v522_v41, %v2487_v3  ;;  %v691_v9 = vsel %vm191_vm2, %v519_v39, %v2486_v4 }
 0x674   :  { %v2490_v2 = vpop.permute.xlu0 %2489 }
 0x675   :  { %v2492_v5 = vunpack.i.h.bf16 %v2490_v2  ;;  %v2491_v6 = vunpack.i.l.bf16 %v2490_v2 }
 0x677   :  { %v693_v12 = vsel %vm386_vm3, %v691_v9, %v2491_v6  ;;  %v694_v13 = vsel %vm386_vm3, %v692_v8, %v2492_v5 }
 0x678   :  { %v2495_v7 = vpop.permute.xlu1 %2494 }
 0x679   :  { %v2497_v10 = vunpack.i.h.bf16 %v2495_v7  ;;  %v2496_v11 = vunpack.i.l.bf16 %v2495_v7 }
 0x67b   :  { %v697_v14 = vsel %vm695_vm4, %v694_v13, %v2497_v10  ;;  %v696_v42 = vsel %vm695_vm4, %v693_v12, %v2496_v11 }
 0x67c   :  { %v702_v44 = vpack.c.bf16 %v697_v14, %v696_v42 }
 0x67e   :  { %2338 = vmatmul.mubr.msk.bf16.vlgmr.msra.gmra.mrb[16].mxu1 %vm67_vm0, %v702_v44 }
 0x67f   :  { %2357 = vmatprep.mubr.msk.bf16.mxu1 %vm2626_vm1, %v2625_v15  ;;  %2350 = vmatpush3.bf16.msra.mxu1 %v2519_v60 }
 0x680   :  { %2351 = vmatprep.subr.bf16.mxu1 %v2625_v15 }
 0x683   :  { %2352 = vmatpush3.bf16.msra.mxu1 %v2520_v61 }
 0x684   :  { %2353 = vmatprep.subr.bf16.mxu1 %v2625_v15 }
 0x687   :  { %2354 = vmatpush3.bf16.msra.mxu1 %v2521_v62 }
 0x688   :  { %2355 = vmatprep.subr.bf16.mxu1 %v2625_v15 }
 0x68b   :  { %2356 = vmatpush3.bf16.msra.mxu1 %v2522_v63 }
 0x68c   :  { %2375 = vmatprep.subr.bf16.mxu1 %v2625_v15 }
 0x751   :  { %v759_v43 = vpop.f32.mrb[16].mxu1 }
 0x752   :  { %v760_v17 = vadd.f32 %v2130_v16, %v759_v43  ;;  %v2339_v18 = vpop.f32.mrb[17].mxu1 }
 0x753   :  { %v762_v19 = vpop.f32.mrb[18].mxu1 }
 0x754   :  { %v763_v20 = vadd.f32 %v2130_v16, %v762_v19  ;;  %v2340_v21 = vpop.f32.mrb[19].mxu1  ;;  %v766_v22 = vadd.f32 %v760_v17, %v2766_v31 }
 0x756   :  { %v770_v23 = vsel %vm67_vm0, %v766_v22, 0.0  ;;  %v767_v24 = vadd.f32 %v763_v20, %v2768_v32  ;;  %v2517_v32 = vld [vmem:[%s3187_s11] sm:$0xff]  }
 0x757   :  { %771 = vadd.xlane.f32.xlu0 %v770_v23  ;;  %2342 = vmatpush3.bf16.msra.mxu0 %v2517_v32 }
 0x758   :  { %v773_v25 = vsel %vm67_vm0, %v767_v24, 0.0  ;;  %2343 = vmatprep.subr.bf16.mxu0 %v2625_v15 }
 0x759   :  { %774 = vadd.xlane.f32.xlu1 %v773_v25 }
 0x75b   :  { %2344 = vmatpush3.bf16.msra.mxu0 %v2518_v37 }
 0x75c   :  { %2361 = vmatprep.subr.bf16.mxu0 %v2625_v15 }
 0x7e4   :  { %v772_v26 = vpop.xlane.xlu0 %771 }
 0x7e5   :  { %v776_v27 = vmul.f32 0.03125, %v772_v26 }
 0x7e6   :  { %v775_v28 = vpop.xlane.xlu1 %774 }
 0x7e7   :  { %v778_v29 = vsub.f32 %v766_v22, %v776_v27  ;;  %v777_v30 = vmul.f32 0.03125, %v775_v28 }
 0x7e9   :  { %v779_v33 = vsub.f32 %v767_v24, %v777_v30  ;;  %v780_v34 = vmul.f32 %v778_v29, %v778_v29  ;;  %v2140_v24 = vld [vmem:[%s3192_s14] ss:$0 sm:$0xff] }
 0x7eb   :  { %v782_v35 = vsel %vm67_vm0, %v780_v34, 0.0  ;;  %v781_v36 = vmul.f32 %v779_v33, %v779_v33 }
 0x7ec   :  { %783 = vadd.xlane.f32.xlu0 %v782_v35 }
 0x7ed   :  { %v785_v31 = vsel %vm67_vm0, %v781_v36, 0.0 }
 0x7f0   :  { %786 = vadd.xlane.f32.xlu0 %v785_v31 }
 0x879   :  { %v784_v38 = vpop.xlane.xlu0 %783 }
 0x87a   :  { %v788_v39 = vmul.f32 0.03125, %v784_v38 }
 0x87c   :  { %v790_v40 = vadd.f32 1e-12, %v788_v39 }
 0x87d   :  { %v787_v41 = vpop.xlane.xlu0 %786 }
 0x87e   :  { %2569 = vrsqrt.f32 %v790_v40  ;;  %v789_v45 = vmul.f32 0.03125, %v787_v41 }
 0x880   :  { %v791_v46 = vadd.f32 1e-12, %v789_v45 }
 0x882   :  { %2571 = vrsqrt.f32 %v791_v46 }
 0x888   :  { %v2570_v47 = vpop.eup %2569 }
 0x889   :  { %v794_v48 = vmul.f32 %v2570_v47, %v778_v29 }
 0x88b   :  { %v802_v51 = vmul.f32 %v2134_v49, %v794_v48  ;;  %v2523_v48 = vld [vmem:[%s3206_s23 + $0x10] sm:$0xff]  }
 0x88c   :  { %v2572_v50 = vpop.eup %2571 }
 0x88d   :  { %v795_v52 = vmul.f32 %v2572_v50, %v779_v33  ;;  %v810_v57 = vadd.f32 %v2135_v54, %v802_v51 }
 0x88f   :  { %v803_v56 = vmul.f32 %v2134_v49, %v795_v52  ;;  %v2524_v49 = vld [vmem:[%s3206_s23 + $0x18] sm:$0xff]  }
 0x891   :  { %v811_v58 = vadd.f32 %v2135_v54, %v803_v56 }
 0x893   :  { %v816_v59 = vpack.c.bf16 %v811_v58, %v810_v57 }
 0x895   :  { %2346 = vmatmul.mubr.msk.bf16.vlgmr.msra.gmra.mrb[20].mxu0 %vm67_vm0, %v816_v59  ;;  %v2146_v59 = vld [vmem:[%s3193_s15] ss:$0 sm:$0xff] }
 0x896   :  { %2365 = vmatprep.mubr.msk.bf16.mxu0 %vm2626_vm1, %v2625_v15  ;;  %2362 = vmatpush3.bf16.msra.mxu0 %v2523_v48 }
 0x897   :  { %2363 = vmatprep.subr.bf16.mxu0 %v2625_v15 }
 0x89a   :  { %2364 = vmatpush3.bf16.msra.mxu0 %v2524_v49 }
 0x89b   :  { %2369 = vmatprep.subr.bf16.mxu0 %v2625_v15 }
 0x968   :  { %v873_v1 = vpop.f32.mrb[20].mxu0 }
 0x969   :  { %v874_v2 = vadd.f32 %v2136_v0, %v873_v1  ;;  %v2347_v3 = vpop.f32.mrb[21].mxu0 }
 0x96a   :  { %v876_v4 = vpop.f32.mrb[22].mxu0 }
 0x96b   :  { %v880_v5 = vmul.f32 %v874_v2, %v874_v2  ;;  %v877_v6 = vadd.f32 %v2136_v0, %v876_v4  ;;  %v2348_v7 = vpop.f32.mrb[23].mxu0  ;;  %v2147_v0 = vld [vmem:[%s3194_s16] ss:$0 sm:$0xff] }
 0x96d   :  { %v882_v8 = vmul.f32 %v880_v5, %v874_v2  ;;  %v881_v9 = vmul.f32 %v877_v6, %v877_v6  ;;  %v2153_v5 = vld [vmem:[%s3183_s6 + $0x1] ss:$0 sm:$0xff] }
 0x96f   :  { %v884_v10 = vmul.f32 0.044715, %v882_v8  ;;  %v883_v11 = vmul.f32 %v881_v9, %v877_v6 }
 0x971   :  { %v886_v12 = vadd.f32 %v884_v10, %v874_v2  ;;  %v885_v13 = vmul.f32 0.044715, %v883_v11 }
 0x973   :  { %v888_v14 = vmul.f32 0.7978846, %v886_v12  ;;  %v887_v42 = vadd.f32 %v885_v13, %v877_v6 }
 0x975   :  { %2573 = vtanh.f32 %v888_v14  ;;  %v889_v44 = vmul.f32 0.7978846, %v887_v42 }
 0x977   :  { %2575 = vtanh.f32 %v889_v44 }
 0x97f   :  { %v2574_v16 = vpop.eup %2573 }
 0x980   :  { %v892_v43 = vadd.f32 1.0, %v2574_v16 }
 0x981   :  { %v2576_v17 = vpop.eup %2575 }
 0x982   :  { %v894_v18 = vmul.f32 0.5, %v892_v43  ;;  %v893_v19 = vadd.f32 1.0, %v2576_v17 }
 0x984   :  { %v895_v20 = vmul.f32 0.5, %v893_v19  ;;  %v896_v21 = vmul.f32 %v894_v18, %v874_v2 }
 0x986   :  { %v897_v22 = vmul.f32 %v895_v20, %v877_v6 }
 0x988   :  { %v906_v23 = vpack.c.bf16 %v897_v22, %v896_v21 }
 0x98a   :  { %2358 = vmatmul.mubr.msk.bf16.vlgmr.msra.gmra.mrb[20].mxu1 %vm938_vm5, %v906_v23 }
 0x98b   :  { %2377 = vmatprep.mubr.msk.bf16.mxu1 %vm2626_vm1, %v2625_v15 }
 0xa5d   :  { %v976_v25 = vpop.f32.mrb[20].mxu1 }
 0xa5e   :  { %v977_v26 = vadd.f32 %v2140_v24, %v976_v25  ;;  %v2359_v27 = vpop.f32.mrb[21].mxu1 }
 0xa5f   :  { %v979_v28 = vpop.f32.mrb[22].mxu1 }
 0xa60   :  { %v980_v29 = vadd.f32 %v2140_v24, %v979_v28  ;;  %v2360_v30 = vpop.f32.mrb[23].mxu1  ;;  %v983_v33 = vadd.f32 %v977_v26, %v810_v57 }
 0xa62   :  { %v987_v34 = vsel %vm67_vm0, %v983_v33, 0.0  ;;  %v984_v35 = vadd.f32 %v980_v29, %v811_v58 }
 0xa63   :  { %988 = vadd.xlane.f32.xlu0 %v987_v34 }
 0xa64   :  { %v990_v36 = vsel %vm67_vm0, %v984_v35, 0.0 }
 0xa65   :  { %991 = vadd.xlane.f32.xlu1 %v990_v36 }
 0xaf0   :  { %v989_v31 = vpop.xlane.xlu0 %988 }
 0xaf1   :  { %v993_v32 = vmul.f32 0.03125, %v989_v31 }
 0xaf2   :  { %v992_v37 = vpop.xlane.xlu1 %991 }
 0xaf3   :  { %v995_v38 = vsub.f32 %v983_v33, %v993_v32  ;;  %v994_v39 = vmul.f32 0.03125, %v992_v37 }
 0xaf5   :  { %v996_v40 = vsub.f32 %v984_v35, %v994_v39  ;;  %v997_v41 = vmul.f32 %v995_v38, %v995_v38 }
 0xaf7   :  { %v999_v45 = vsel %vm67_vm0, %v997_v41, 0.0  ;;  %v998_v46 = vmul.f32 %v996_v40, %v996_v40 }
 0xaf8   :  { %1000 = vadd.xlane.f32.xlu0 %v999_v45 }
 0xaf9   :  { %v1002_v47 = vsel %vm67_vm0, %v998_v46, 0.0 }
 0xafa   :  { %1003 = vadd.xlane.f32.xlu1 %v1002_v47 }
 0xb85   :  { %v1001_v50 = vpop.xlane.xlu0 %1000 }
 0xb86   :  { %v1005_v51 = vmul.f32 0.03125, %v1001_v50 }
 0xb87   :  { %v1004_v52 = vpop.xlane.xlu1 %1003 }
 0xb88   :  { %v1007_v54 = vadd.f32 1e-12, %v1005_v51  ;;  %v1006_v56 = vmul.f32 0.03125, %v1004_v52 }
 0xb8a   :  { %2577 = vrsqrt.f32 %v1007_v54  ;;  %v1008_v57 = vadd.f32 1e-12, %v1006_v56 }
 0xb8c   :  { %2579 = vrsqrt.f32 %v1008_v57 }
 0xb94   :  { %v2578_v58 = vpop.eup %2577 }
 0xb95   :  { %v1011_v60 = vmul.f32 %v2578_v58, %v995_v38 }
 0xb96   :  { %v2580_v61 = vpop.eup %2579 }
 0xb97   :  { %v1019_v62 = vmul.f32 %v2146_v59, %v1011_v60  ;;  %v1012_v63 = vmul.f32 %v2580_v61, %v996_v40 }
 0xb99   :  { %v1020_v1 = vmul.f32 %v2146_v59, %v1012_v63  ;;  %v2971_v2 = vadd.f32 %v2147_v0, %v1019_v62 }
 0xb9b   :  { %v2973_v3 = vadd.f32 %v2147_v0, %v1020_v1 }
 0xb9d   :  { %v1034_v4 = vpack.c.bf16 %v2973_v3, %v2971_v2 }
 0xb9f   :  { %2366 = vmatmul.mubr.msk.bf16.vlgmr.msra.gmra.mrb[24].mxu0 %vm67_vm0, %v1034_v4 }
 0xba0   :  { %2371 = vmatprep.mubr.msk.bf16.mxu0 %vm2626_vm1, %v2625_v15 }
 0xc72   :  { %v1092_v6 = vpop.f32.mrb[24].mxu0 }
 0xc73   :  { %v2367_v7 = vpop.f32.mrb[25].mxu0  ;;  %v1093_v9 = vadd.f32 %v2153_v5, %v1092_v6 }
 0xc74   :  { %v1095_v8 = vpop.f32.mrb[26].mxu0 }
 0xc75   :  { %v1096_v10 = vadd.f32 %v2153_v5, %v1095_v8  ;;  %v2368_v11 = vpop.f32.mrb[27].mxu0 }
 0xc77   :  { %v2983_v12 = vpack.c.bf16 %v1096_v10, %v1093_v9 }
 0xc79   :  { %1103 = vrot.lane.b32.xlu1 %v2983_v12, %s2627_s21  ;;  %1101 = vrot.lane.b32.xlu0 %v2983_v12, %s2628_s5 }
 0xc7d   :  { %1105 = vrot.lane.b32.xlu1 %v2983_v12, %s2629_s22 }
 0xc81   :  { %1107 = vrot.lane.b32.xlu1 %v2983_v12, %s2630_s3 }
 0xceb   :  { %v2993_v13 = vpop.permute.xlu1 %1103  ;;  %v2995_v14 = vpop.permute.xlu0 %1101 }
 0xcec   :  { %1205 = vrot.lane.b32.xlu1 %v2993_v13, %s2630_s3  ;;  %1156 = vrot.lane.b32.xlu0 %v2995_v14, %s2630_s3 }
 0xcef   :  { %v3001_v42 = vpop.permute.xlu1 %1105 }
 0xcf0   :  { %1254 = vrot.lane.b32.xlu0 %v3001_v42, %s2630_s3 }
 0xcf3   :  { %v1108_v44 = vpop.permute.xlu1 %1107 }
 0xcf4   :  { %v1113_v16 = vsel %vm191_vm2, %v1108_v44, 0 }
 0xcf5   :  { %2370 = vmatpush3.bf16.xpose.msra.mxu0 %v1113_v16 }
 0xcf6   :  { %2381 = vmatprep.subr.bf16.mxu0 %v2625_v15 }
 0xcfc   :  { %2372 = vmatmul.mubr.msk.bf16.vlgmr.msra.gmra.mrb[28].mxu0 %vm191_vm2, %v2983_v12 }
 0xcfd   :  { %2383 = vmatprep.mubr.msk.bf16.mxu0 %vm2626_vm1, %v2625_v15 }
 0xd5e   :  { %v1206_v43 = vpop.permute.xlu1 %1205  ;;  %v1157_v17 = vpop.permute.xlu0 %1156 }
 0xd5f   :  { %v1211_v18 = vsel %vm191_vm2, %v1206_v43, 0  ;;  %v1162_v19 = vsel %vm191_vm2, %v1157_v17, 0 }
 0xd60   :  { %2376 = vmatpush3.bf16.xpose.msra.mxu1 %v1162_v19  ;;  %2382 = vmatpush3.bf16.xpose.msra.mxu0 %v1211_v18 }
 0xd61   :  { %2387 = vmatprep.subr.bf16.mxu1 %v2625_v15  ;;  %2393 = vmatprep.subr.bf16.mxu0 %v2625_v15 }
 0xd62   :  { %v1255_v20 = vpop.permute.xlu0 %1254 }
 0xd63   :  { %v1260_v21 = vsel %vm191_vm2, %v1255_v20, 0 }
 0xd67   :  { %2378 = vmatmul.mubr.msk.bf16.vlgmr.msra.gmra.mrb[24].mxu1 %vm191_vm2, %v2995_v14  ;;  %2384 = vmatmul.mubr.msk.bf16.vlgmr.msra.gmra.mrb[32].mxu0 %vm191_vm2, %v2993_v13 }
 0xd68   :  { %2388 = vmatpush3.bf16.xpose.msra.mxu1 %v1260_v21  ;;  %2389 = vmatprep.mubr.msk.bf16.mxu1 %vm2626_vm1, %v2625_v15 }
 0xd69   :  { %2395 = vmatprep.mubr.msk.bf16.mxu0 %vm2626_vm1, %v2625_v15  ;;  %2399 = vmatprep.subr.bf16.mxu1 %v2625_v15 }
 0xd6f   :  { %2390 = vmatmul.mubr.msk.bf16.vlgmr.msra.gmra.mrb[28].mxu1 %vm191_vm2, %v3001_v42 }
 0xd70   :  { %2401 = vmatprep.mubr.msk.bf16.mxu1 %vm2626_vm1, %v2625_v15 }
 0xdcf   :  { %v1149_v22 = vpop.f32.mrb[28].mxu0 }
 0xdd0   :  { %v1150_v23 = vadd.f32 %v1149_v22, %v2827_v53  ;;  %v2373_v24 = vpop.f32.mrb[29].mxu0 }
 0xdd1   :  { %v1152_v25 = vpop.f32.mrb[30].mxu0 }
 0xdd2   :  { %v1153_v26 = vadd.f32 %v1152_v25, %v2832_v55  ;;  %v2374_v27 = vpop.f32.mrb[31].mxu0  ;;  %v1303_v28 = vsel %vm386_vm3, %v1150_v23, -inf }
 0xdd3   :  { %1304 = vmax.xlane.f32.xlu1 %v1303_v28 }
 0xdd4   :  { %v1306_v29 = vsel %vm386_vm3, %v1153_v26, -inf }
 0xdd5   :  { %1307 = vmax.xlane.f32.xlu0 %v1306_v29 }
 0xe3a   :  { %v1198_v30 = vpop.f32.mrb[24].mxu1  ;;  %v1247_v33 = vpop.f32.mrb[32].mxu0 }
 0xe3b   :  { %v1199_v34 = vadd.f32 %v1198_v30, %v2827_v53  ;;  %v1248_v35 = vadd.f32 %v1247_v33, %v2827_v53  ;;  %v2379_v36 = vpop.f32.mrb[25].mxu1  ;;  %v2385_v31 = vpop.f32.mrb[33].mxu0 }
 0xe3c   :  { %v1201_v32 = vpop.f32.mrb[26].mxu1  ;;  %v1250_v37 = vpop.f32.mrb[34].mxu0 }
 0xe3d   :  { %v1202_v38 = vadd.f32 %v1201_v32, %v2832_v55  ;;  %v2380_v39 = vpop.f32.mrb[27].mxu1  ;;  %v2386_v40 = vpop.f32.mrb[35].mxu0  ;;  %v1309_v41 = vsel %vm386_vm3, %v1199_v34, -inf  ;;  %v1315_v45 = vsel %vm386_vm3, %v1248_v35, -inf  ;;  %v1251_v46 = vadd.f32 %v1250_v37, %v2832_v55 }
 0xe3e   :  { %1310 = vmax.xlane.f32.xlu0 %v1309_v41  ;;  %1316 = vmax.xlane.f32.xlu1 %v1315_v45 }
 0xe3f   :  { %v1312_v47 = vsel %vm386_vm3, %v1202_v38, -inf  ;;  %v1318_v57 = vsel %vm386_vm3, %v1251_v46, -inf }
 0xe42   :  { %v1296_v48 = vpop.f32.mrb[28].mxu1  ;;  %1313 = vmax.xlane.f32.xlu0 %v1312_v47 }
 0xe43   :  { %v1297_v49 = vadd.f32 %v1296_v48, %v2827_v53  ;;  %v2391_v50 = vpop.f32.mrb[29].mxu1 }
 0xe44   :  { %v1299_v51 = vpop.f32.mrb[30].mxu1 }
 0xe45   :  { %v1300_v52 = vadd.f32 %v1299_v51, %v2832_v55  ;;  %v2392_v54 = vpop.f32.mrb[31].mxu1  ;;  %v1321_v56 = vsel %vm386_vm3, %v1297_v49, -inf }
 0xe46   :  { %1322 = vmax.xlane.f32.xlu1 %v1321_v56  ;;  %1319 = vmax.xlane.f32.xlu0 %v1318_v57 }
 0xe47   :  { %v1324_v58 = vsel %vm386_vm3, %v1300_v52, -inf }
 0xe4a   :  { %1325 = vmax.xlane.f32.xlu0 %v1324_v58 }
 0xe57   :  { %1395 = vrot.lane.b32.xlu1 %v2983_v12, %s2631_s1 }
 0xe60   :  { %v1305_v59 = vpop.xlane.xlu1 %1304 }
 0xe61   :  { %v1327_v61 = vsub.f32 %v1150_v23, %v1305_v59 }
 0xe62   :  { %v1308_v60 = vpop.xlane.xlu0 %1307 }
 0xe63   :  { %v1328_v53 = vsub.f32 %v1153_v26, %v1308_v60  ;;  %v1335_v55 = vmul.f32 1.442695, %v1327_v61 }
 0xe65   :  { %v1337_v62 = vmul.f32 1.442695, %v1328_v53 }
 0xe67   :  { %2581 = vpow2.f32 %v1337_v62 }
 0xe68   :  { %2583 = vpow2.f32 %v1335_v55 }
 0xe71   :  { %v2582_v63 = vpop.eup %2581 }
 0xe72   :  { %v1354_v0 = vsel %vm386_vm3, %v2582_v63, 0.0  ;;  %v2584_v1 = vpop.eup %2583 }
 0xe73   :  { %1355 = vadd.xlane.f32.xlu0 %v1354_v0  ;;  %v1351_v4 = vsel %vm386_vm3, %v2584_v1, 0.0 }
 0xe7b   :  { %1352 = vadd.xlane.f32.xlu1 %v1351_v4 }
 0xecb   :  { %v1311_v5 = vpop.xlane.xlu0 %1310  ;;  %v1317_v6 = vpop.xlane.xlu1 %1316 }
 0xecc   :  { %v1329_v7 = vsub.f32 %v1199_v34, %v1311_v5  ;;  %v1331_v8 = vsub.f32 %v1248_v35, %v1317_v6 }
 0xece   :  { %v1339_v9 = vmul.f32 1.442695, %v1329_v7  ;;  %v1343_v10 = vmul.f32 1.442695, %v1331_v8 }
 0xecf   :  { %v1314_v11 = vpop.xlane.xlu0 %1313 }
 0xed0   :  { %2585 = vpow2.f32 %v1339_v9  ;;  %v1330_v12 = vsub.f32 %v1202_v38, %v1314_v11 }
 0xed1   :  { %2587 = vpow2.f32 %v1343_v10  ;;  %v2525_v10 = vld [vmem:[%s3185_s7 + $0x10] sm:$0xff]  }
 0xed2   :  { %v1341_v44 = vmul.f32 1.442695, %v1330_v12  ;;  %v2526_v12 = vld [vmem:[%s3185_s7 + $0x18] sm:$0xff]  }
 0xed3   :  { %v1323_v16 = vpop.xlane.xlu1 %1322  ;;  %v1320_v43 = vpop.xlane.xlu0 %1319 }
 0xed4   :  { %2589 = vpow2.f32 %v1341_v44  ;;  %v1333_v17 = vsub.f32 %v1297_v49, %v1323_v16  ;;  %v1332_v18 = vsub.f32 %v1251_v46, %v1320_v43 }
 0xed6   :  { %v1347_v19 = vmul.f32 1.442695, %v1333_v17  ;;  %v1345_v20 = vmul.f32 1.442695, %v1332_v18 }
 0xed7   :  { %v1396_v21 = vpop.permute.xlu1 %1395  ;;  %v1326_v22 = vpop.xlane.xlu0 %1325 }
 0xed8   :  { %2591 = vpow2.f32 %v1347_v19  ;;  %v1334_v23 = vsub.f32 %v1300_v52, %v1326_v22  ;;  %2394 = vmatpush3.bf16.msra.mxu0 %v1396_v21 }
 0xed9   :  { %2593 = vpow2.f32 %v1345_v20  ;;  %2405 = vmatprep.subr.bf16.mxu0 %v2625_v15 }
 0xeda   :  { %v2586_v24 = vpop.eup %2585  ;;  %v1349_v25 = vmul.f32 1.442695, %v1334_v23 }
 0xedb   :  { %v1357_v26 = vsel %vm386_vm3, %v2586_v24, 0.0  ;;  %v2588_v27 = vpop.eup %2587 }
 0xedc   :  { %2595 = vpow2.f32 %v1349_v25  ;;  %1358 = vadd.xlane.f32.xlu1 %v1357_v26  ;;  %v1363_v29 = vsel %vm386_vm3, %v2588_v27, 0.0 }
 0xede   :  { %v2590_v28 = vpop.eup %2589 }
 0xedf   :  { %v1360_v30 = vsel %vm386_vm3, %v2590_v28, 0.0 }
 0xee0   :  { %1364 = vadd.xlane.f32.xlu1 %v1363_v29  ;;  %1361 = vadd.xlane.f32.xlu0 %v1360_v30 }
 0xee2   :  { %v2592_v33 = vpop.eup %2591 }
 0xee3   :  { %v2594_v34 = vpop.eup %2593  ;;  %v1369_v35 = vsel %vm386_vm3, %v2592_v33, 0.0 }
 0xee4   :  { %1370 = vadd.xlane.f32.xlu1 %v1369_v35  ;;  %v1366_v36 = vsel %vm386_vm3, %v2594_v34, 0.0 }
 0xee5   :  { %1367 = vadd.xlane.f32.xlu0 %v1366_v36 }
 0xee6   :  { %v2596_v31 = vpop.eup %2595 }
 0xee7   :  { %v1372_v32 = vsel %vm386_vm3, %v2596_v31, 0.0 }
 0xee9   :  { %1373 = vadd.xlane.f32.xlu0 %v1372_v32 }
 0xef5   :  { %1489 = vrot.lane.b32.xlu1 %v2993_v13, %s2631_s1 }
 0xef9   :  { %1536 = vrot.lane.b32.xlu1 %v3001_v42, %s2631_s1 }
 0xeff   :  { %1442 = vrot.lane.b32.xlu0 %v2995_v14, %s2631_s1 }
 0xf00   :  { %v1356_v37 = vpop.xlane.xlu0 %1355 }
 0xf01   :  { %2597 = vrcp.f32 %v1356_v37 }
 0xf08   :  { %v1353_v38 = vpop.xlane.xlu1 %1352 }
 0xf09   :  { %2599 = vrcp.f32 %v1353_v38 }
 0xf0b   :  { %v2598_v39 = vpop.eup %2597 }
 0xf0c   :  { %v1384_v41 = vmul.f32 %v2598_v39, %v2582_v63 }
 0xf13   :  { %v2600_v40 = vpop.eup %2599 }
 0xf14   :  { %v1383_v45 = vmul.f32 %v2600_v40, %v2584_v1 }
 0xf16   :  { %v1391_v46 = vpack.c.bf16 %v1384_v41, %v1383_v45 }
 0xf18   :  { %2396 = vmatmul.mubr.msk.bf16.vlgmr.msra.gmra.mrb[36].mxu0 %vm386_vm3, %v1391_v46 }
 0xf19   :  { %2407 = vmatprep.mubr.msk.bf16.mxu0 %vm2626_vm1, %v2625_v15 }
 0xf69   :  { %v1359_v13 = vpop.xlane.xlu1 %1358 }
 0xf6a   :  { %2601 = vrcp.f32 %v1359_v13  ;;  %v2170_v13 = vld [vmem:[%s3186_s8 + $0x1] ss:$0 sm:$0xff] }
 0xf6d   :  { %v1365_v42 = vpop.xlane.xlu1 %1364  ;;  %v1362_v47 = vpop.xlane.xlu0 %1361 }
 0xf6e   :  { %2603 = vrcp.f32 %v1362_v47 }
 0xf6f   :  { %2605 = vrcp.f32 %v1365_v42 }
 0xf71   :  { %v1371_v14 = vpop.xlane.xlu1 %1370 }
 0xf72   :  { %v1368_v48 = vpop.xlane.xlu0 %1367 }
 0xf73   :  { %2607 = vrcp.f32 %v1368_v48 }
 0xf74   :  { %2609 = vrcp.f32 %v1371_v14  ;;  %v2602_v51 = vpop.eup %2601 }
 0xf75   :  { %v1490_v49 = vpop.permute.xlu1 %1489  ;;  %v1385_v54 = vmul.f32 %v2602_v51, %v2586_v24 }
 0xf76   :  { %v1374_v50 = vpop.xlane.xlu0 %1373  ;;  %2406 = vmatpush3.bf16.msra.mxu0 %v1490_v49 }
 0xf77   :  { %2611 = vrcp.f32 %v1374_v50  ;;  %2417 = vmatprep.subr.bf16.mxu0 %v2625_v15 }
 0xf78   :  { %v2604_v52 = vpop.eup %2603 }
 0xf79   :  { %v1386_v56 = vmul.f32 %v2604_v52, %v2590_v28  ;;  %v2606_v58 = vpop.eup %2605  ;;  %v1537_v62 = vpop.permute.xlu1 %1536 }
 0xf7a   :  { %v1443_v57 = vpop.permute.xlu0 %1442  ;;  %v1387_v53 = vmul.f32 %v2606_v58, %v2588_v27 }
 0xf7b   :  { %2400 = vmatpush3.bf16.msra.mxu1 %v1443_v57  ;;  %v1392_v59 = vpack.c.bf16 %v1386_v56, %v1385_v54 }
 0xf7c   :  { %2411 = vmatprep.subr.bf16.mxu1 %v2625_v15 }
 0xf7d   :  { %v2608_v60 = vpop.eup %2607 }
 0xf7e   :  { %v1388_v61 = vmul.f32 %v2608_v60, %v2594_v34  ;;  %2402 = vmatmul.mubr.msk.bf16.vlgmr.msra.gmra.mrb[32].mxu1 %vm386_vm3, %v1392_v59  ;;  %v2610_v55 = vpop.eup %2609 }
 0xf7f   :  { %2412 = vmatpush3.bf16.msra.mxu1 %v1537_v62  ;;  %2413 = vmatprep.mubr.msk.bf16.mxu1 %vm2626_vm1, %v2625_v15  ;;  %v1389_v1 = vmul.f32 %v2610_v55, %v2592_v33 }
 0xf80   :  { %v1393_v63 = vpack.c.bf16 %v1388_v61, %v1387_v53  ;;  %2425 = vmatprep.subr.bf16.mxu1 %v2625_v15 }
 0xf81   :  { %v2612_v0 = vpop.eup %2611 }
 0xf82   :  { %v1390_v4 = vmul.f32 %v2612_v0, %v2596_v31  ;;  %2408 = vmatmul.mubr.msk.bf16.vlgmr.msra.gmra.mrb[40].mxu0 %vm386_vm3, %v1393_v63  ;;  %v2528_v0 = vld [vmem:[%s3187_s11 + $0x18] sm:$0xff]  }
 0xf83   :  { %2421 = vmatprep.mubr.msk.bf16.mxu0 %vm2626_vm1, %v2625_v15  ;;  %2418 = vmatpush3.bf16.msra.mxu0 %v2525_v10 }
 0xf84   :  { %v1394_v5 = vpack.c.bf16 %v1390_v4, %v1389_v1  ;;  %2419 = vmatprep.subr.bf16.mxu0 %v2625_v15 }
 0xf86   :  { %2414 = vmatmul.mubr.msk.bf16.vlgmr.msra.gmra.mrb[36].mxu1 %vm386_vm3, %v1394_v5 }
 0xf87   :  { %2429 = vmatprep.mubr.msk.bf16.mxu1 %vm2626_vm1, %v2625_v15  ;;  %2420 = vmatpush3.bf16.msra.mxu0 %v2526_v12 }
 0xf88   :  { %2433 = vmatprep.subr.bf16.mxu0 %v2625_v15 }
 0xfeb   :  { %v1435_v6 = vpop.f32.mrb[36].mxu0 }
 0xfec   :  { %v2397_v7 = vpop.f32.mrb[37].mxu0 }
 0xfed   :  { %v1438_v8 = vpop.f32.mrb[38].mxu0 }
 0xfee   :  { %v2398_v9 = vpop.f32.mrb[39].mxu0 }
0x1051   :  { %v1482_v11 = vpop.f32.mrb[32].mxu1 }
0x1052   :  { %v2403_v44 = vpop.f32.mrb[33].mxu1 }
0x1053   :  { %v1485_v16 = vpop.f32.mrb[34].mxu1 }
0x1054   :  { %v2498_v43 = vpack.i.bf16 %v1485_v16, %v1482_v11  ;;  %v2404_v17 = vpop.f32.mrb[35].mxu1  ;;  %v2176_v11 = vld [vmem:[%s3188_s9 + $0x1] ss:$0 sm:$0xff] }
0x1055   :  { %v1529_v18 = vpop.f32.mrb[40].mxu0 }
0x1056   :  { %2499 = vrot.lane.b32.xlu1 %v2498_v43, %s2632_s30  ;;  %v2409_v19 = vpop.f32.mrb[41].mxu0  ;;  %v2177_v43 = vld [vmem:[%s3189_s10 + $0x1] ss:$0 sm:$0xff] }
0x1057   :  { %v1532_v20 = vpop.f32.mrb[42].mxu0 }
0x1058   :  { %v2503_v21 = vpack.i.bf16 %v1532_v20, %v1529_v18  ;;  %v2410_v22 = vpop.f32.mrb[43].mxu0 }
0x1059   :  { %v1576_v23 = vpop.f32.mrb[36].mxu1  ;;  %v2530_v22 = vld [vmem:[%s3190_s13 + $0x28] sm:$0xff]  }
0x105a   :  { %v2415_v24 = vpop.f32.mrb[37].mxu1  ;;  %2504 = vrot.lane.b32.xlu0 %v2503_v21, %s2633_s20  ;;  %v2529_v21 = vld [vmem:[%s3190_s13 + $0x20] sm:$0xff]  }
0x105b   :  { %v1579_v25 = vpop.f32.mrb[38].mxu1  ;;  %v2532_v24 = vld [vmem:[%s3190_s13 + $0x38] sm:$0xff]  }
0x105c   :  { %v2508_v26 = vpack.i.bf16 %v1579_v25, %v1576_v23  ;;  %v2416_v27 = vpop.f32.mrb[39].mxu1  ;;  %v2531_v23 = vld [vmem:[%s3190_s13 + $0x30] sm:$0xff]   ;;  %v2183_v25 = vld [vmem:[%s3191_s12 + $0x1] ss:$0 sm:$0xff] }
0x105e   :  { %2509 = vrot.lane.b32.xlu1 %v2508_v26, %s2634_s24 }
0x10c8   :  { %v2500_v28 = vpop.permute.xlu1 %2499 }
0x10c9   :  { %v2502_v30 = vunpack.i.h.bf16 %v2500_v28  ;;  %v2501_v33 = vunpack.i.l.bf16 %v2500_v28 }
0x10cb   :  { %v1607_v31 = vsel %vm191_vm2, %v1435_v6, %v2501_v33  ;;  %v1608_v32 = vsel %vm191_vm2, %v1438_v8, %v2502_v30 }
0x10cc   :  { %v2505_v29 = vpop.permute.xlu0 %2504 }
0x10cd   :  { %v2507_v34 = vunpack.i.h.bf16 %v2505_v29  ;;  %v2506_v35 = vunpack.i.l.bf16 %v2505_v29 }
0x10cf   :  { %v1610_v39 = vsel %vm386_vm3, %v1608_v32, %v2507_v34  ;;  %v1609_v40 = vsel %vm386_vm3, %v1607_v31, %v2506_v35 }
0x10d0   :  { %v2510_v36 = vpop.permute.xlu1 %2509 }
0x10d1   :  { %v2512_v37 = vunpack.i.h.bf16 %v2510_v36  ;;  %v2511_v38 = vunpack.i.l.bf16 %v2510_v36 }
0x10d3   :  { %v1611_v41 = vsel %vm695_vm4, %v1609_v40, %v2511_v38  ;;  %v1612_v45 = vsel %vm695_vm4, %v1610_v39, %v2512_v37 }
0x10d4   :  { %v1618_v46 = vpack.c.bf16 %v1612_v45, %v1611_v41 }
0x10d6   :  { %2422 = vmatmul.mubr.msk.bf16.vlgmr.msra.gmra.mrb[44].mxu0 %vm67_vm0, %v1618_v46 }
0x10d7   :  { %2441 = vmatprep.mubr.msk.bf16.mxu0 %vm2626_vm1, %v2625_v15  ;;  %2434 = vmatpush3.bf16.msra.mxu0 %v2529_v21 }
0x10d8   :  { %2435 = vmatprep.subr.bf16.mxu0 %v2625_v15 }
0x10db   :  { %2436 = vmatpush3.bf16.msra.mxu0 %v2530_v22  ;;  %v2205_v22 = vld [vmem:[%s3194_s16 + $0x1] ss:$0 sm:$0xff] }
0x10dc   :  { %2437 = vmatprep.subr.bf16.mxu0 %v2625_v15 }
0x10df   :  { %2438 = vmatpush3.bf16.msra.mxu0 %v2531_v23 }
0x10e0   :  { %2439 = vmatprep.subr.bf16.mxu0 %v2625_v15 }
0x10e3   :  { %2440 = vmatpush3.bf16.msra.mxu0 %v2532_v24 }
0x11a9   :  { %v1676_v42 = vpop.f32.mrb[44].mxu0 }
0x11aa   :  { %v1677_v47 = vadd.f32 %v2170_v13, %v1676_v42  ;;  %v2423_v14 = vpop.f32.mrb[45].mxu0 }
0x11ab   :  { %v1679_v48 = vpop.f32.mrb[46].mxu0 }
0x11ac   :  { %v1680_v49 = vadd.f32 %v2170_v13, %v1679_v48  ;;  %v2424_v50 = vpop.f32.mrb[47].mxu0  ;;  %v1683_v51 = vadd.f32 %v1677_v47, %v2971_v2 }
0x11ae   :  { %v1689_v52 = vsel %vm67_vm0, %v1683_v51, 0.0  ;;  %v1684_v54 = vadd.f32 %v1680_v49, %v2973_v3  ;;  %v2527_v3 = vld [vmem:[%s3187_s11 + $0x10] sm:$0xff]  }
0x11af   :  { %1690 = vadd.xlane.f32.xlu0 %v1689_v52  ;;  %2426 = vmatpush3.bf16.msra.mxu1 %v2527_v3 }
0x11b0   :  { %v1692_v56 = vsel %vm67_vm0, %v1684_v54, 0.0  ;;  %2427 = vmatprep.subr.bf16.mxu1 %v2625_v15 }
0x11b1   :  { %1693 = vadd.xlane.f32.xlu1 %v1692_v56 }
0x11b3   :  { %2428 = vmatpush3.bf16.msra.mxu1 %v2528_v0 }
0x123c   :  { %v1691_v57 = vpop.xlane.xlu0 %1690 }
0x123d   :  { %v1695_v58 = vmul.f32 0.03125, %v1691_v57 }
0x123e   :  { %v1694_v59 = vpop.xlane.xlu1 %1693 }
0x123f   :  { %v1697_v60 = vsub.f32 %v1683_v51, %v1695_v58  ;;  %v1696_v53 = vmul.f32 0.03125, %v1694_v59  ;;  %v2196_v51 = vld [vmem:[%s3192_s14 + $0x1] ss:$0 sm:$0xff] }
0x1241   :  { %v1698_v61 = vsub.f32 %v1684_v54, %v1696_v53  ;;  %v1699_v62 = vmul.f32 %v1697_v60, %v1697_v60 }
0x1243   :  { %v1701_v55 = vsel %vm67_vm0, %v1699_v62, 0.0  ;;  %v1700_v63 = vmul.f32 %v1698_v61, %v1698_v61 }
0x1244   :  { %1702 = vadd.xlane.f32.xlu0 %v1701_v55 }
0x1245   :  { %v1704_v2 = vsel %vm67_vm0, %v1700_v63, 0.0 }
0x1248   :  { %1705 = vadd.xlane.f32.xlu0 %v1704_v2 }
0x12d1   :  { %v1703_v1 = vpop.xlane.xlu0 %1702 }
0x12d2   :  { %v1707_v4 = vmul.f32 0.03125, %v1703_v1 }
0x12d4   :  { %v1709_v5 = vadd.f32 1e-12, %v1707_v4 }
0x12d5   :  { %v1706_v6 = vpop.xlane.xlu0 %1705 }
0x12d6   :  { %2613 = vrsqrt.f32 %v1709_v5  ;;  %v1708_v7 = vmul.f32 0.03125, %v1706_v6 }
0x12d8   :  { %v1710_v8 = vadd.f32 1e-12, %v1708_v7 }
0x12da   :  { %2615 = vrsqrt.f32 %v1710_v8  ;;  %v2635_v8 = vmov 0.0|0.0  }
0x12db   :  { %2463 = vmatprep.subr.bf16.mxu1 %v2635_v8 }
0x12e0   :  { %v2614_v9 = vpop.eup %2613 }
0x12e1   :  { %v1713_v10 = vmul.f32 %v2614_v9, %v1697_v60 }
0x12e3   :  { %v1721_v44 = vmul.f32 %v2176_v11, %v1713_v10 }
0x12e4   :  { %v2616_v12 = vpop.eup %2615 }
0x12e5   :  { %v1714_v16 = vmul.f32 %v2616_v12, %v1698_v61  ;;  %v1729_v18 = vadd.f32 %v2177_v43, %v1721_v44 }
0x12e7   :  { %v1722_v17 = vmul.f32 %v2176_v11, %v1714_v16 }
0x12e9   :  { %v1730_v19 = vadd.f32 %v2177_v43, %v1722_v17  ;;  %v2204_v17 = vld [vmem:[%s3193_s15 + $0x1] ss:$0 sm:$0xff] }
0x12eb   :  { %v1736_v20 = vpack.c.bf16 %v1730_v19, %v1729_v18 }
0x12ed   :  { %2430 = vmatmul.mubr.msk.bf16.vlgmr.msra.gmra.mrb[40].mxu1 %vm67_vm0, %v1736_v20 }
0x12ee   :  { %2449 = vmatprep.mubr.msk.f32.mxu1 %vm2626_vm1, %v2625_v15 }
0x13c0   :  { %v1794_v26 = vpop.f32.mrb[40].mxu1 }
0x13c1   :  { %v1795_v27 = vadd.f32 %v2183_v25, %v1794_v26  ;;  %v2431_v28 = vpop.f32.mrb[41].mxu1  ;;  %v2027_v26 = vld [vmem:[%s3195_s17] sm:$0xff] }
0x13c2   :  { %v1797_v29 = vpop.f32.mrb[42].mxu1 }
0x13c3   :  { %v1801_v30 = vmul.f32 %v1795_v27, %v1795_v27  ;;  %v1798_v33 = vadd.f32 %v2183_v25, %v1797_v29  ;;  %v2432_v34 = vpop.f32.mrb[43].mxu1  ;;  %v1953_v29 = vld [vmem:[%s3196_s2] sm:$0xff] }
0x13c4   :  { %v2030_v34 = vld [vmem:[%s3195_s17 + $0x18] sm:$0xff] }
0x13c5   :  { %v1803_v35 = vmul.f32 %v1801_v30, %v1795_v27  ;;  %v1802_v36 = vmul.f32 %v1798_v33, %v1798_v33 }
0x13c7   :  { %v1805_v31 = vmul.f32 0.044715, %v1803_v35  ;;  %v1804_v32 = vmul.f32 %v1802_v36, %v1798_v33 }
0x13c9   :  { %v1807_v37 = vadd.f32 %v1805_v31, %v1795_v27  ;;  %v1806_v38 = vmul.f32 0.044715, %v1804_v32  ;;  %v2207_v32 = vld [vmem:[%s3197_s18] ss:$0 sm:$0xff] }
0x13cb   :  { %v1809_v39 = vmul.f32 0.7978846, %v1807_v37  ;;  %v1808_v40 = vadd.f32 %v1806_v38, %v1798_v33 }
0x13cd   :  { %2617 = vtanh.f32 %v1809_v39  ;;  %v1810_v41 = vmul.f32 0.7978846, %v1808_v40 }
0x13cf   :  { %2619 = vtanh.f32 %v1810_v41 }
0x13d7   :  { %v2618_v45 = vpop.eup %2617 }
0x13d8   :  { %v1813_v46 = vadd.f32 1.0, %v2618_v45 }
0x13d9   :  { %v2620_v13 = vpop.eup %2619 }
0x13da   :  { %v1815_v42 = vmul.f32 0.5, %v1813_v46  ;;  %v1814_v47 = vadd.f32 1.0, %v2620_v13 }
0x13dc   :  { %v1816_v14 = vmul.f32 0.5, %v1814_v47  ;;  %v1817_v48 = vmul.f32 %v1815_v42, %v1795_v27  ;;  %v2028_v27 = vld [vmem:[%s3195_s17 + $0x8] sm:$0xff] }
0x13dd   :  { %v2467_v30 = vpack.c.bf16 %v2028_v27, %v2027_v26 }
0x13de   :  { %v1818_v49 = vmul.f32 %v1816_v14, %v1798_v33  ;;  %v2029_v33 = vld [vmem:[%s3195_s17 + $0x10] sm:$0xff] }
0x13df   :  { %v2470_v35 = vpack.c.bf16 %v2030_v34, %v2029_v33 }
0x13e0   :  { %v1828_v50 = vpack.c.bf16 %v1818_v49, %v1817_v48 }
0x13e2   :  { %2442 = vmatmul.mubr.msk.bf16.vlgmr.msra.gmra.mrb[48].mxu0 %vm938_vm5, %v1828_v50 }
0x14b5   :  { %v1898_v52 = vpop.f32.mrb[48].mxu0 }
0x14b6   :  { %v1899_v54 = vadd.f32 %v2196_v51, %v1898_v52  ;;  %v2443_v56 = vpop.f32.mrb[49].mxu0 }
0x14b7   :  { %v1901_v57 = vpop.f32.mrb[50].mxu0 }
0x14b8   :  { %v1902_v58 = vadd.f32 %v2196_v51, %v1901_v57  ;;  %v2444_v59 = vpop.f32.mrb[51].mxu0  ;;  %v1905_v60 = vadd.f32 %v1899_v54, %v1729_v18 }
0x14ba   :  { %v1911_v53 = vsel %vm67_vm0, %v1905_v60, 0.0  ;;  %v1906_v61 = vadd.f32 %v1902_v58, %v1730_v19 }
0x14bb   :  { %1912 = vadd.xlane.f32.xlu0 %v1911_v53 }
0x14bc   :  { %v1914_v62 = vsel %vm67_vm0, %v1906_v61, 0.0 }
0x14bd   :  { %1915 = vadd.xlane.f32.xlu1 %v1914_v62 }
0x1548   :  { %v1913_v55 = vpop.xlane.xlu0 %1912 }
0x1549   :  { %v1917_v63 = vmul.f32 0.03125, %v1913_v55 }
0x154a   :  { %v1916_v2 = vpop.xlane.xlu1 %1915 }
0x154b   :  { %v1919_v3 = vsub.f32 %v1905_v60, %v1917_v63  ;;  %v1918_v0 = vmul.f32 0.03125, %v1916_v2 }
0x154d   :  { %v1920_v1 = vsub.f32 %v1906_v61, %v1918_v0  ;;  %v1921_v4 = vmul.f32 %v1919_v3, %v1919_v3 }
0x154f   :  { %v1923_v5 = vsel %vm67_vm0, %v1921_v4, 0.0  ;;  %v1922_v6 = vmul.f32 %v1920_v1, %v1920_v1 }
0x1550   :  { %1924 = vadd.xlane.f32.xlu0 %v1923_v5 }
0x1551   :  { %v1926_v7 = vsel %vm67_vm0, %v1922_v6, 0.0 }
0x1552   :  { %1927 = vadd.xlane.f32.xlu1 %v1926_v7 }
0x15dd   :  { %v1925_v9 = vpop.xlane.xlu0 %1924 }
0x15de   :  { %v1929_v10 = vmul.f32 0.03125, %v1925_v9 }
0x15df   :  { %v1928_v11 = vpop.xlane.xlu1 %1927 }
0x15e0   :  { %v1931_v12 = vadd.f32 1e-12, %v1929_v10  ;;  %v1930_v44 = vmul.f32 0.03125, %v1928_v11 }
0x15e2   :  { %2621 = vrsqrt.f32 %v1931_v12  ;;  %v1932_v16 = vadd.f32 1e-12, %v1930_v44 }
0x15e4   :  { %2623 = vrsqrt.f32 %v1932_v16 }
0x15ec   :  { %v2622_v43 = vpop.eup %2621 }
0x15ed   :  { %v1935_v18 = vmul.f32 %v2622_v43, %v1919_v3 }
0x15ee   :  { %v2624_v19 = vpop.eup %2623 }
0x15ef   :  { %v1936_v20 = vmul.f32 %v2624_v19, %v1920_v1  ;;  %v1943_v21 = vmul.f32 %v2204_v17, %v1935_v18 }
0x15f1   :  { %v1944_v23 = vmul.f32 %v2204_v17, %v1936_v20  ;;  %v1951_v24 = vadd.f32 %v2205_v22, %v1943_v21 }
0x15f3   :  { %v1952_v25 = vadd.f32 %v2205_v22, %v1944_v23 }
0x15f5   :  { %v2464_v28 = vpack.c.bf16 %v1952_v25, %v1951_v24 }
0x15f7   :  { %2465 = vmatpush3.bf16.msra.mxu1 %v2464_v28 }
0x15f8   :  { %2466 = vmatprep.subr.bf16.mxu1 %v2635_v8 }
0x15fa   :  { %2450 = vmatmul.mubr.msk.f32.vlgmr.msra.gmra.mrb[44].mxu1 %vm386_vm3, %v1953_v29 }
0x15fb   :  { %2468 = vmatpush3.bf16.msra.mxu1 %v2467_v30  ;;  %2460 = vmatprep.mubr.msk.f32.mxu1 %vm2626_vm1, %v2625_v15 }
0x15fc   :  { %2469 = vmatprep.subr.bf16.mxu1 %v2635_v8 }
0x15ff   :  { %2471 = vmatpush3.bf16.msra.mxu1 %v2470_v35 }
0x16cd   :  { %v2023_v36 = vpop.f32.mrb[44].mxu1 }
0x16ce   :  { %v2451_v31 = vpop.f32.mrb[45].mxu1  ;;  %2461 = vmatmul.mubr.msk.f32.vlgmr.msra.gmra.mrb[46].mxu1 %vm67_vm0, %v2023_v36 }
0x17a1   :  { %v2107_v37 = vpop.f32.mrb[46].mxu1 }
0x17a2   :  { %v2108_v38 = vadd.f32 %v2207_v32, %v2107_v37  ;;  %v2462_v39 = vpop.f32.mrb[47].mxu1 }
0x17a4   :  { %2111 = vst [vmem:[%s3198_s19] sm:$0xff] %v2108_v38 }

</bundles_post_ra>
